<compile_context>
chip_gen: v7x
topology: tpu7x:2x2x1
jax: 0.10.0
libtpu: 0.0.40
codegen_flags: <defaults>
</compile_context>

<pallas_src>
import jax
import jax.numpy as jnp
from jax.experimental import pallas as pl
from jax.experimental.pallas import tpu as pltpu


def se_conv_kernel(x339_ref, x337t_ref, w1t_ref, b1_ref, w2t_ref, o_ref):
    # --- SE gate (recomputed per output tile; negligible vs. the w2 DMA) ---
    s = jnp.maximum(x339_ref[...], 0.0).astype(jnp.bfloat16)           # [1, C_mid]
    # 1x1 conv 144 -> 1512 with bias == lane-dense matvec on the MXU.
    g = jnp.dot(s, w1t_ref[...], preferred_element_type=jnp.float32)   # [1, C_gate]
    g = g + b1_ref[...]
    scale = jax.nn.sigmoid(g)                                           # [1, C_gate]

    # --- gate * features, then the 1512->1512 1x1 conv ---------------------
    # scale broadcasts along the sublane (HW) axis: cheap sublane replication.
    scaled = (scale * x337t_ref[...]).astype(jnp.bfloat16)              # [HW, C_gate]
    # out_T tile = scaled @ w2_T[:, tile]  -> lane-dense [HW, TILE_N] output.
    o_ref[...] = jnp.dot(scaled, w2t_ref[...],
                         preferred_element_type=jnp.float32).astype(o_ref.dtype)


def module_forward(x339, x337, w1, b1, w2, *, tile_n=384):
    n, c_mid, _, _ = x339.shape
    n2, c_out, h, w = x337.shape
    assert n == 1 and n2 == 1
    hw = h * w

    # Pad conv2's output-channel dim up to a multiple of tile_n (itself a
    # multiple of 128) so every output tile is lane-dense and (8,128)-legal.
    assert tile_n % 128 == 0
    c_out_pad = ((c_out + tile_n - 1) // tile_n) * tile_n
    n_tiles = c_out_pad // tile_n

    # Layout plumbing (outside the kernel; in a real model the weight
    # transpose/cast/pad would be done once at load time).
    x339_row = x339.reshape(1, c_mid)                          # [1, C_mid]     f32
    x337_t = x337.reshape(c_out, hw).T                         # [HW, C_gate]   f32
    w1_t = w1.T.astype(jnp.bfloat16)                           # [C_mid, C_gate]
    b1_row = b1.reshape(1, c_out)                              # [1, C_gate]    f32
    w2_t = jnp.pad(w2.T.astype(jnp.bfloat16),
                   ((0, 0), (0, c_out_pad - c_out)))           # [C_gate, C_out_pad]

    out_t = pl.pallas_call(
        se_conv_kernel,
        out_shape=jax.ShapeDtypeStruct((hw, c_out_pad), jnp.float32),
        grid=(n_tiles,),
        in_specs=[
            pl.BlockSpec((1, c_mid), lambda j: (0, 0)),        # x339 row (resident)
            pl.BlockSpec((hw, c_out), lambda j: (0, 0)),       # x337_T   (resident)
            pl.BlockSpec((c_mid, c_out), lambda j: (0, 0)),    # w1_T     (resident)
            pl.BlockSpec((1, c_out), lambda j: (0, 0)),        # b1 row   (resident)
            pl.BlockSpec((c_out, tile_n), lambda j: (0, j)),   # w2_T column tile
        ],
        out_specs=pl.BlockSpec((hw, tile_n), lambda j: (0, j)),
        compiler_params=pltpu.CompilerParams(
            dimension_semantics=("parallel",)),
    )(x339_row, x337_t, w1_t, b1_row, w2_t)

    # Strip channel padding and go back to NCHW.
    return out_t[:, :c_out].T.reshape(1, c_out, h, w)


def reference_forward(x339, x337, w1, b1, w2):
    """Plain-JAX mirror of the PyTorch forward, applying the same bf16 weight
    quantization / bf16 MXU inputs (with f32 accumulation) as the kernel."""
    c_mid = x339.shape[1]
    _, c_out, h, w = x337.shape
    s = jnp.maximum(x339.reshape(1, c_mid), 0.0).astype(jnp.bfloat16)
    g = jnp.dot(s, w1.T.astype(jnp.bfloat16),
                preferred_element_type=jnp.float32) + b1.reshape(1, c_out)
    scale = jax.nn.sigmoid(g)                                   # [1, C]
    x337_t = x337.reshape(c_out, h * w).T                       # [HW, C]
    scaled = (scale * x337_t).astype(jnp.bfloat16)
    out_t = jnp.dot(scaled, w2.T.astype(jnp.bfloat16),
                    preferred_element_type=jnp.float32)         # [HW, C]
    return out_t.T.reshape(1, c_out, h, w)


if __name__ == "__main__":
    C_MID, C_OUT, H, W = 144, 1512, 7, 7

    key = jax.random.PRNGKey(0)
    k1, k2, k3, k4, k5 = jax.random.split(key, 5)

    # Inputs (match the module's shapes).
    x339 = jax.random.normal(k1, (1, C_MID, 1, 1), dtype=jnp.float32)
    x337 = jax.random.normal(k2, (1, C_OUT, H, W), dtype=jnp.float32)

    # Deterministic synthetic parameters.
    w1 = jax.random.normal(k3, (C_OUT, C_MID), dtype=jnp.float32) * 0.05  # conv2d108 weight
    b1 = jax.random.normal(k4, (C_OUT,), dtype=jnp.float32) * 0.05        # conv2d108 bias
    w2 = jax.random.normal(k5, (C_OUT, C_OUT), dtype=jnp.float32) * 0.02  # conv2d109 weight

    out = module_forward(x339, x337, w1, b1, w2)
    out = jax.block_until_ready(out)

    ref = reference_forward(x339, x337, w1, b1, w2)
    assert out.shape == (1, C_OUT, H, W)
    assert jnp.allclose(out, ref, atol=1e-3, rtol=1e-3)

    print("KERNEL_OK")
</pallas_src>

<mosaic_0001>
module attributes {stable_mosaic.version = 11 : i64} {
  func.func @se_conv_kernel(%arg0: i32, %arg1: memref<1x144xf32, #tpu.memory_space<vmem>>, %arg2: memref<49x1512xf32, #tpu.memory_space<vmem>>, %arg3: memref<144x1512xbf16, #tpu.memory_space<vmem>>, %arg4: memref<1x1512xf32, #tpu.memory_space<vmem>>, %arg5: memref<1512x384xbf16, #tpu.memory_space<vmem>>, %arg6: memref<49x384xf32, #tpu.memory_space<vmem>>) attributes {dimension_semantics = [#tpu.dimension_semantics<parallel>], iteration_bounds = array<i64: 4>, scalar_prefetch = 0 : i64, scratch_operands = 0 : i64, tpu.core_type = #tpu.core_type<tc>, window_params = [{pipeline_mode = #tpu.pipeline_mode<synchronous>, transform_indices = @transform_0, window_bounds = array<i64: 1, 144>}, {pipeline_mode = #tpu.pipeline_mode<synchronous>, transform_indices = @transform_1, window_bounds = array<i64: 49, 1512>}, {pipeline_mode = #tpu.pipeline_mode<synchronous>, transform_indices = @transform_2, window_bounds = array<i64: 144, 1512>}, {pipeline_mode = #tpu.pipeline_mode<synchronous>, transform_indices = @transform_3, window_bounds = array<i64: 1, 1512>}, {transform_indices = @transform_4, window_bounds = array<i64: 1512, 384>}, {transform_indices = @transform_5, window_bounds = array<i64: 49, 384>}]} {
    %c0 = arith.constant 0 : index
    %c0_0 = arith.constant 0 : index
    %0 = vector.load %arg1[%c0, %c0_0] : memref<1x144xf32, #tpu.memory_space<vmem>>, vector<1x144xf32>
    %cst = arith.constant 0.000000e+00 : f32
    %1 = vector.broadcast %cst : f32 to vector<1x144xf32>
    %2 = arith.maximumf %0, %1 : vector<1x144xf32>
    %3 = arith.truncf %2 : vector<1x144xf32> to vector<1x144xbf16>
    %c0_1 = arith.constant 0 : index
    %c0_2 = arith.constant 0 : index
    %4 = vector.load %arg3[%c0_1, %c0_2] : memref<144x1512xbf16, #tpu.memory_space<vmem>>, vector<144x1512xbf16>
    %cst_3 = arith.constant dense<0.000000e+00> : vector<1x1512xf32>
    %5 = tpu.matmul %3, %4, %cst_3 {dimension_numbers = #tpu.dot_dimension_numbers<[1], [0], [0], [1], [0, 0, 1, 1], [], []>} : vector<1x144xbf16>, vector<144x1512xbf16>, vector<1x1512xf32> -> vector<1x1512xf32>
    %c0_4 = arith.constant 0 : index
    %c0_5 = arith.constant 0 : index
    %6 = vector.load %arg4[%c0_4, %c0_5] : memref<1x1512xf32, #tpu.memory_space<vmem>>, vector<1x1512xf32>
    %7 = arith.addf %5, %6 : vector<1x1512xf32>
    %8 = arith.negf %7 : vector<1x1512xf32>
    %9 = math.exp %8 : vector<1x1512xf32>
    %cst_6 = arith.constant 1.000000e+00 : f32
    %10 = vector.broadcast %cst_6 : f32 to vector<1x1512xf32>
    %11 = arith.addf %10, %9 : vector<1x1512xf32>
    %12 = arith.divf %10, %11 : vector<1x1512xf32>
    %c0_7 = arith.constant 0 : index
    %c0_8 = arith.constant 0 : index
    %13 = vector.load %arg2[%c0_7, %c0_8] : memref<49x1512xf32, #tpu.memory_space<vmem>>, vector<49x1512xf32>
    %14 = vector.broadcast %12 : vector<1x1512xf32> to vector<49x1512xf32>
    %15 = arith.mulf %14, %13 : vector<49x1512xf32>
    %16 = arith.truncf %15 : vector<49x1512xf32> to vector<49x1512xbf16>
    %c0_9 = arith.constant 0 : index
    %c0_10 = arith.constant 0 : index
    %17 = vector.load %arg5[%c0_9, %c0_10] : memref<1512x384xbf16, #tpu.memory_space<vmem>>, vector<1512x384xbf16>
    %cst_11 = arith.constant dense<0.000000e+00> : vector<49x384xf32>
    %18 = tpu.matmul %16, %17, %cst_11 {dimension_numbers = #tpu.dot_dimension_numbers<[1], [0], [0], [1], [0, 0, 1, 1], [], []>} : vector<49x1512xbf16>, vector<1512x384xbf16>, vector<49x384xf32> -> vector<49x384xf32>
    %c0_12 = arith.constant 0 : index
    %c0_13 = arith.constant 0 : index
    %19 = vector.load %arg6[%c0_12, %c0_13] : memref<49x384xf32, #tpu.memory_space<vmem>>, vector<49x384xf32>
    tpu.vector_store %arg6[%c0_12, %c0_13], %18 {strides = array<i32>} : memref<49x384xf32, #tpu.memory_space<vmem>>, vector<49x384xf32>,
    return
  }
  func.func @transform_0(%arg0: i32) -> (i32, i32) {
    %c0_i32 = arith.constant 0 : i32
    %c0_i32_0 = arith.constant 0 : i32
    %c0_i32_1 = arith.constant 0 : i32
    return %c0_i32, %c0_i32_0 : i32, i32
  }
  func.func @transform_1(%arg0: i32) -> (i32, i32) {
    %c0_i32 = arith.constant 0 : i32
    %c0_i32_0 = arith.constant 0 : i32
    %c0_i32_1 = arith.constant 0 : i32
    return %c0_i32, %c0_i32_0 : i32, i32
  }
  func.func @transform_2(%arg0: i32) -> (i32, i32) {
    %c0_i32 = arith.constant 0 : i32
    %c0_i32_0 = arith.constant 0 : i32
    %c0_i32_1 = arith.constant 0 : i32
    return %c0_i32, %c0_i32_0 : i32, i32
  }
  func.func @transform_3(%arg0: i32) -> (i32, i32) {
    %c0_i32 = arith.constant 0 : i32
    %c0_i32_0 = arith.constant 0 : i32
    %c0_i32_1 = arith.constant 0 : i32
    return %c0_i32, %c0_i32_0 : i32, i32
  }
  func.func @transform_4(%arg0: i32) -> (i32, i32) {
    %c0_i32 = arith.constant 0 : i32
    %c0_i32_0 = arith.constant 0 : i32
    return %c0_i32, %arg0 : i32, i32
  }
  func.func @transform_5(%arg0: i32) -> (i32, i32) {
    %c0_i32 = arith.constant 0 : i32
    %c0_i32_0 = arith.constant 0 : i32
    return %c0_i32, %arg0 : i32, i32
  }
}

</mosaic_0001>

<bundles_post_ra>
// kernel: tpu_custom_call.1
= control target key start
LH: loop header
LB: loop body
LE: loop exit
PB: predicated region body
PF: predicated region fallthrough
CT: control target
= control target key end

     0   :  { %s7164_s0 = inlined_call_operand.hbm [shape: f32[1,144], index: 0, kind: input, shape index: {}]   ;;  %s7165_s1 = inlined_call_operand.hbm [shape: f32[49,1512], index: 1, kind: input, shape index: {}]   ;;  %s7166_s2 = inlined_call_operand.hbm [shape: bf16[144,1512], index: 2, kind: input, shape index: {}]   ;;  %s7167_s3 = inlined_call_operand.hbm [shape: f32[1,1512], index: 3, kind: input, shape index: {}]   ;;  %s7168_s4 = inlined_call_operand.hbm [shape: bf16[1512,1536], index: 4, kind: input, shape index: {}]   ;;  %s7169_s5 = inlined_call_operand.hbm [shape: f32[49,1536], index: 5, kind: output, shape index: {}]  }
   0x1   :  { %7178 = sst [smem:[#allocation20_spill]] %s7164_s0 }
   0x2   :  { %7179 = sst [smem:[#allocation21_spill]] %s7165_s1 }
   0x3   :  { %10 = vsyncpa [#allocation3], 0 }
   0x4   :  { %11 = vsyncpa [#allocation6], 0 }
   0x5   :  { %12 = vsyncpa [#allocation9], 0 }
   0x6   :  { %13 = vsyncpa [#allocation4], 0 }
   0x7   :  { %15 = vsyncpa [#allocation4 + $0x1], 0  ;;  %s6153_s18 = smov 0   ;;  %s6155_s19 = smov 0  }
   0x8   :  { %s6157_s20 = smov 0   ;;  %s6159_s21 = smov 0  }
   0x9 LB: > { %s6174_s22 = sadd.s32 4294967295, %s6105_s21   ;;  %s4480_s23 = sadd.s32 4294967294, %s6105_s21   ;;  %s6105_s21 = sphi %s6159_s21, %s7205_s21   ;;  %s6101_s20 = sphi %s6157_s20, %s7209_s20   ;;  %s6097_s19 = sphi %s6155_s19, %s7208_s19   ;;  %s6093_s18 = sphi %s6153_s18, %s7207_s18  }
   0xa   : > { %s6178_s24 = sadd.s32 1, %s6105_s21   ;;  %s112_s25 = sadd.s32 1, %s6101_s20 }
   0xb   : > { %7180 = sst [smem:[#allocation17_spill]] %s6178_s24  ;;  %s109_s26 = ssub.s32 %s6105_s21, %s6178_s24 }
   0xc   : > { %p119_p0 = scmp.ne.s32.totalorder %s6101_s20, %s6097_s19  ;;  %p110_p1 = scmp.eq.s32.totalorder %s109_s26, 0 }
   0xd   : > { %p120_p2 = scmp.eq.s32.totalorder %s6105_s21, 0  ;;  %p125_p3 = scmp.ne.s32.totalorder %s6097_s19, %s6093_s18 }
   0xe   : > { %p7170_p4 = scmp.eq.s32.totalorder %s6174_s22, 0  ;;  %p149_p7 = scmp.eq.s32.totalorder %s6174_s22, 3 }
   0xf   : > { %s6190_s27 = scalar_select %p110_p1, %s6101_s20, %s112_s25  }
  0x10   : > { %p6192_p5 = por %p120_p2, %p119_p0  ;;  %p6198_p6 = por %p7170_p4, %p125_p3 }
  0x11   : > { %7181 = sst [smem:[#allocation18_spill]] %s6190_s27  ;;  %p155_p8 = scmp.eq.s32.totalorder %s4480_s23, 3 }
  0x12   : > { %s7183_s29 = scalar_select %p6198_p6, 1, 0 }
  0x13   : > { %p4481_p9 = scmp.ge.s32.totalorder %s6105_s21, 1  ;;  %p162_p10 = scmp.lt.s32.totalorder %s6105_s21, 5 }
  0x14   : > { %p6205_p11 = por %p149_p7, %p119_p0  ;;  %p6209_p12 = por %p155_p8, %p125_p3 }
  0x15   : > { %p6213_p13 = pnand %p4481_p9, %p162_p10  ;;  %s6107_s8 = smov [#allocation2]  }
  0x16   : > { %s7184_s30 = scalar_select %p6205_p11, 1, 0 }
  0x17   : > { %s7185_s6 = scalar_select %p6209_p12, 1, 0 }
  0x18   : > { %s7187_s7 = scalar_select %p6213_p13, 1, 0 }
  0x19   : > { %7186 = sst [smem:[#allocation19_spill]] %s7185_s6  ;;  %p5219_p1 = pneg %p6213_p13 }
  0x1a   : > { %s175_s9 = sshll.u32 %s6107_s8, 4  ;;  %p5244_p2 = scmp.lt.s32.totalorder %s6105_s21, 4  ;;  %s176_s9 = int_to_ptr.vmem [resolvable:$true] %s175_s9 }
  0x1b   : > { %p6222_p0 = pnand %p5219_p1, %p7170_p4  ;;  %s6108_s12 = smov [#allocation5]  }
  0x1c   : > { %p6228_p3 = pnand %p5244_p2, %p6192_p5  ;;  %s185_s13 = sshll.u32 %s6108_s12, 4  ;;  %s6232_s13 = int_to_ptr.vmem [resolvable:$true] %s185_s13 }
  0x1d   : > { %s7190_s0 = sld [smem:[#allocation20_spill]]  ;;  %p6242_p8 = pneg %p6222_p0 }
  0x1e   : > { %s7189_s11 = scalar_select %p6228_p3, 1, 0 }
  0x23   : > { %s5885_s16 = scalar_lea.hbm %s7190_s0, 32 }
  0x24   : > { %p5886_p7 = scmp.ne.s32.totalorder %s7190_s0, %s5885_s16  ;;  %p5892_p10 = scmp.lt.u32.totalorder %s5885_s16, %s7190_s0 }
  0x26   : > { %p5888_p5 = pnand %p6242_p8, %p5886_p7 }
  0x28   : > { %p5889_p9 = pneg %p5888_p5 }
  0x2a   : > { %p5894_p1 = pnand %p5892_p10, %p5889_p9 }
  0x2c   : > { %5897 = shalt.err (!%p5894_p1)
}
  0x2d   : > { %s5898_s8 = scalar_lea.vmem %s176_s9, 32  ;;  %p5906_p11 = scmp.lt.s32.totalorder %s176_s9, %s176_s9 }
  0x2e   : > { %p5899_p2 = scmp.ne.s32.totalorder %s176_s9, %s5898_s8  ;;  %p5907_p6 = scmp.lt.s32.totalorder %s5898_s8, %s5898_s8 }
  0x30   : > { %p5901_p4 = pnand %p5899_p2, %p6242_p8  ;;  %p5908_p13 = por %p5907_p6, %p5906_p11 }
  0x32   : > { %p5902_p12 = pneg %p5901_p4 }
  0x34   : > { %p5909_p3 = pnand %p5908_p13, %p5902_p12 }
  0x36   : > { %5912 = shalt.err (!%p5909_p3)
}
  0x37   : > { %5222 = dma.hbm_to_vmem [thread:$0]  (!%p6222_p0), %s7190_s0, 32, %s176_s9, [#allocation3]  }
  0x38   : > { %s7192_s1 = sld [smem:[#allocation21_spill]] }
  0x3e   : > { %s5913_s17 = scalar_lea.hbm %s7192_s1, 10752 }
  0x3f   : > { %p5914_p4 = scmp.ne.s32.totalorder %s7192_s1, %s5913_s17  ;;  %p5920_p11 = scmp.lt.u32.totalorder %s5913_s17, %s7192_s1 }
  0x41   : > { %p5916_p7 = pnand %p5914_p4, %p6242_p8 }
  0x43   : > { %p5917_p6 = pneg %p5916_p7 }
  0x45   : > { %p5922_p12 = pnand %p5920_p11, %p5917_p6 }
  0x47   : > { %5925 = shalt.err (!%p5922_p12)
}
  0x48   : > { %s5926_s9 = scalar_lea.vmem %s6232_s13, 10752  ;;  %p5934_p9 = scmp.lt.s32.totalorder %s6232_s13, %s6232_s13 }
  0x49   : > { %p5927_p13 = scmp.ne.s32.totalorder %s6232_s13, %s5926_s9  ;;  %p5935_p10 = scmp.lt.s32.totalorder %s5926_s9, %s5926_s9 }
  0x4b   : > { %p5929_p3 = pnand %p5927_p13, %p6242_p8  ;;  %p5936_p1 = por %p5935_p10, %p5934_p9 }
  0x4d   : > { %p5930_p5 = pneg %p5929_p3 }
  0x4f   : > { %p5937_p2 = pnand %p5936_p1, %p5930_p5 }
  0x51   : > { %5940 = shalt.err (!%p5937_p2)
}
  0x52   : > { %s6109_s12 = smov 1536   ;;  %s6110_s14 = smov 96  }
  0x53   : > { %5225 = dma.hbm_to_vmem [thread:$0]  (!%p6222_p0), %s7192_s1, 10752, %s6232_s13, [#allocation6], %s6109_s12, %s6109_s12, %s6110_s14  }
  0x54   : > { %s6111_s17 = smov [#allocation7]   ;;  %s5941_s8 = scalar_lea.hbm %s7166_s2, 13824 }
  0x55   : > { %s198_s23 = sshll.u32 %s6111_s17, 4  ;;  %p5942_p4 = scmp.ne.s32.totalorder %s7166_s2, %s5941_s8  ;;  %s199_s23 = int_to_ptr.vmem [resolvable:$true] %s198_s23 }
  0x56   : > { %p5948_p11 = scmp.lt.u32.totalorder %s5941_s8, %s7166_s2 }
  0x57   : > { %p5944_p7 = pnand %p5942_p4, %p6242_p8 }
  0x59   : > { %p5945_p6 = pneg %p5944_p7 }
  0x5b   : > { %p5950_p12 = pnand %p5948_p11, %p5945_p6 }
  0x5d   : > { %5953 = shalt.err (!%p5950_p12)
}
  0x5e   : > { %s5954_s13 = scalar_lea.vmem %s199_s23, 13824  ;;  %p5962_p9 = scmp.lt.s32.totalorder %s199_s23, %s199_s23 }
  0x5f   : > { %p5955_p13 = scmp.ne.s32.totalorder %s199_s23, %s5954_s13  ;;  %p5963_p10 = scmp.lt.s32.totalorder %s5954_s13, %s5954_s13 }
  0x61   : > { %p5957_p3 = pnand %p5955_p13, %p6242_p8  ;;  %p5964_p1 = por %p5963_p10, %p5962_p9 }
  0x63   : > { %p5958_p5 = pneg %p5957_p3 }
  0x65   : > { %p5965_p2 = pnand %p5964_p1, %p5958_p5 }
  0x67   : > { %5968 = shalt.err (!%p5965_p2)
}
  0x68   : > { %s6112_s0 = smov 768   ;;  %s6113_s24 = smov 48  }
  0x69   : > { %5228 = dma.hbm_to_vmem [thread:$0]  (!%p6222_p0), %s7166_s2, 13824, %s199_s23, [#allocation6], %s6112_s0, %s6112_s0, %s6113_s24  }
  0x6a   : > { %s6114_s14 = smov [#allocation8]   ;;  %s223_s16 = sand.u32 1, %s6105_s21  }
  0x6b   : > { %s212_s15 = sshll.u32 %s6114_s14, 4  ;;  %s225_s17 = sand.u32 1, %s6101_s20   ;;  %s213_s15 = int_to_ptr.vmem [resolvable:$true] %s212_s15 }
  0x6c   : > { %s5969_s8 = scalar_lea.hbm %s7167_s3, 192 }
  0x6d   : > { %p5970_p4 = scmp.ne.s32.totalorder %s7167_s3, %s5969_s8  ;;  %p5976_p11 = scmp.lt.u32.totalorder %s5969_s8, %s7167_s3 }
  0x6f   : > { %p5972_p7 = pnand %p5970_p4, %p6242_p8 }
  0x71   : > { %p5973_p6 = pneg %p5972_p7 }
  0x73   : > { %p5978_p12 = pnand %p5976_p11, %p5973_p6 }
  0x75   : > { %5981 = shalt.err (!%p5978_p12)
}
  0x76   : > { %s5982_s23 = scalar_lea.vmem %s213_s15, 192  ;;  %p5990_p9 = scmp.lt.s32.totalorder %s213_s15, %s213_s15 }
  0x77   : > { %p5983_p13 = scmp.ne.s32.totalorder %s213_s15, %s5982_s23  ;;  %p5991_p10 = scmp.lt.s32.totalorder %s5982_s23, %s5982_s23 }
  0x79   : > { %p5985_p3 = pnand %p5983_p13, %p6242_p8  ;;  %p5992_p1 = por %p5991_p10, %p5990_p9 }
  0x7b   : > { %p5986_p5 = pneg %p5985_p3 }
  0x7d   : > { %p5993_p2 = pnand %p5992_p1, %p5986_p5 }
  0x7f   : > { %5996 = shalt.err (!%p5993_p2)
}
  0x80   : > { %5231 = dma.hbm_to_vmem [thread:$0]  (!%p6222_p0), %s7167_s3, 192, %s213_s15, [#allocation9]  }
  0x81   : > { %s5196_s1 = smul.u32 2268, %s225_s17  ;;  %s6329_s28 = scalar_lea.sflag [#allocation3], %s223_s16 }
  0x82   : > { %s4916_s6 = smul.u32 192, %s6105_s21  ;;  %p7193_p0 = scmp.ne.s32.totalorder %s7189_s11, 0 }
  0x83   : > { %s227_s26 = scalar_lea.vmem [#allocation10], %s5196_s1  ;;  %s6002_s9 = scalar_lea.hbm %s7168_s4, 145152 }
  0x84   : > { %s6325_s14 = scalar_lea.hbm %s7168_s4, %s4916_s6  ;;  %s234_s10 = sshll.u32 %s227_s26, 4  ;;  %s6327_s10 = int_to_ptr.vmem [resolvable:$true] %s234_s10 }
  0x85   : > { %s5997_s8 = scalar_lea.hbm %s6325_s14, 36288  ;;  %p5999_p4 = pneg %p7193_p0 }
  0x86   : > { %p5998_p8 = scmp.ne.s32.totalorder %s6325_s14, %s5997_s8  ;;  %p6003_p11 = scmp.lt.u32.totalorder %s6325_s14, %s7168_s4 }
  0x87   : > { %p6004_p12 = scmp.lt.u32.totalorder %s6002_s9, %s5997_s8  ;;  %p6006_p3 = scmp.lt.u32.totalorder %s5997_s8, %s6325_s14 }
  0x88   : > { %p6000_p7 = pnand %p5999_p4, %p5998_p8 }
  0x89   : > { %p6005_p13 = por %p6004_p12, %p6003_p11 }
  0x8a   : > { %p6001_p6 = pneg %p6000_p7 }
  0x8b   : > { %p6007_p5 = por %p6006_p3, %p6005_p13 }
  0x8d   : > { %p6008_p9 = pnand %p6007_p5, %p6001_p6 }
  0x8f   : > { %6011 = shalt.err (!%p6008_p9)
}
  0x90   : > { %s6012_s16 = scalar_lea.vmem %s6327_s10, 36288  ;;  %s6115_s24 = smov [#allocation10]  }
  0x91   : > { %p6013_p10 = scmp.ne.s32.totalorder %s6327_s10, %s6012_s16  ;;  %s6017_s27 = sshll.u32 %s6115_s24, 4  ;;  %s6018_s27 = int_to_ptr.vmem [resolvable:$false] %s6017_s27 }
  0x92   : > { %s6019_s1 = scalar_lea.vmem %s6018_s27, 72576  ;;  %p6020_p8 = scmp.lt.s32.totalorder %s6327_s10, %s6018_s27 }
  0x93   : > { %p6015_p1 = pnand %p6013_p10, %p5999_p4  ;;  %p6021_p7 = scmp.lt.s32.totalorder %s6019_s1, %s6012_s16 }
  0x95   : > { %p6016_p2 = pneg %p6015_p1  ;;  %p6022_p11 = por %p6021_p7, %p6020_p8 }
  0x97   : > { %p6023_p12 = pnand %p6022_p11, %p6016_p2 }
  0x99   : > { %6026 = shalt.err (!%p6023_p12)
}
  0x9a   : > { %s6116_s6 = smov 192   ;;  %s6117_s12 = smov 12  }
  0x9b   : > { %5235 = dma.hbm_to_vmem [thread:$0]  (!%p7193_p0), %s6325_s14, 36288, %s6327_s10, %s6329_s28, %s6112_s0, %s6116_s6, %s6117_s12  }
  0x9c   : > { %p7194_p4 = scmp.ne.s32.totalorder %s7187_s7, 0 }
  0x9d   : > { %p7195_p6 = scmp.eq.s32.totalorder (!%p7194_p4), %s6174_s22, 0 }
  0x9e   : > { %246 = sbr.rel (%p7194_p4) target bundleno = 971 (0x3cb), region = 40 }
  0xa5   : > { %6072 = dma.done.wait (%p7195_p6), [#allocation3], 32   ;;  %p7196_p13 = pmov %p7195_p6 }
  0xa6   : > { %p7197_p3 = pmov %p7195_p6 }
  0xa7   : > { %6074 = vsyncadd (%p7196_p13), [#allocation3], 4294967264 }
  0xa8   : > { %6076 = dma.done.wait (%p7197_p3), [#allocation6], 24576   ;;  %p7198_p5 = pmov %p7197_p3 }
  0xa9   : > { %p7199_p9 = pmov %p7197_p3 }
  0xaa   : > { %6078 = vsyncadd (%p7198_p5), [#allocation6], 4294942720 }
  0xab   : > { %6080 = dma.done.wait (%p7199_p9), [#allocation9], 192   ;;  %p7200_p0 = pmov %p7197_p3 }
  0xac   : > { %s264_s7 = sand.u32 1, %s6174_s22   ;;  %s6374_s11 = sand.u32 1, %s6097_s19  }
  0xad   : > { %6082 = vsyncadd (%p7200_p0), [#allocation9], 4294967104  ;;  %s5197_s0 = smul.u32 2268, %s6374_s11  ;;  %s265_s25 = scalar_lea.sflag [#allocation3], %s264_s7 }
  0xae   : > { %p7201_p10 = scmp.ne.s32.totalorder %s7183_s29, 0 }
  0xaf   : > { %s6377_s14 = scalar_lea.vmem [#allocation10], %s5197_s0 }
  0xb0   : > { %6084 = dma.done.wait (%p7201_p10), %s265_s25, 36288  }
  0xb1   : > { %6086 = vsyncadd (%p7201_p10), %s265_s25, 4294931008  ;;  %v5296_v0 = vld [vmem:[#allocation7 + $0x4] ss:$48 sps:$4 sm:$0xff]   ;;  %v5298_v1 = vld [vmem:[#allocation7 + $0xc] ss:$48 sps:$4 sm:$0xff]   ;;  %v301_v20 = vlaneseq  ;;  %vm1025_vm0 = vcmask 130048  }
  0xb2   : > { %1029 = vmatprep.subr.bf16.mxu0 %v5296_v0  ;;  %v5300_v2 = vld [vmem:[#allocation7] ss:$48 sps:$4 sm:$0xff]   ;;  %v5301_v3 = vld [vmem:[#allocation7 + $0x8] ss:$48 sps:$4 sm:$0xff]   ;;  %1070 = vmatprep.subr.bf16.mxu1 %v5298_v1  ;;  %v5302_v4 = vld [vmem:[#allocation7 + $0x64] ss:$48 sps:$4 sm:$0xff]  }
  0xb3   : > { %1030 = vmatpush1.bf16.msra.mxu0 %v5300_v2  ;;  %1071 = vmatpush1.bf16.msra.mxu1 %v5301_v3  ;;  %v5304_v5 = vld [vmem:[#allocation7 + $0x6c] ss:$48 sps:$4 sm:$0xff]   ;;  %v5306_v6 = vld [vmem:[#allocation7 + $0x60] ss:$48 sps:$4 sm:$0xff]   ;;  %v5307_v7 = vld [vmem:[#allocation7 + $0x68] ss:$48 sps:$4 sm:$0xff]  }
  0xb4   : > { %1031 = vmatprep.subr.bf16.mxu0 %v5302_v4  ;;  %1072 = vmatprep.subr.bf16.mxu1 %v5304_v5  ;;  %v5308_v8 = vld [vmem:[#allocation7 + $0xc4] ss:$48 sps:$4 sm:$0xff]   ;;  %v5310_v9 = vld [vmem:[#allocation7 + $0xcc] ss:$48 sps:$4 sm:$0xff]   ;;  %v5312_v10 = vld [vmem:[#allocation7 + $0xc0] ss:$48 sps:$4 sm:$0xff]  }
  0xb5   : > { %v5313_v11 = vld [vmem:[#allocation7 + $0xc8] ss:$48 sps:$4 sm:$0xff]   ;;  %v5314_v12 = vld [vmem:[#allocation7 + $0x124] ss:$48 sps:$4 sm:$0xff]   ;;  %v5316_v13 = vld [vmem:[#allocation7 + $0x12c] ss:$48 sps:$4 sm:$0xff]  }
  0xb6   : > { %v5318_v14 = vld [vmem:[#allocation7 + $0x120] ss:$48 sps:$4 sm:$0xff]   ;;  %v5319_v15 = vld [vmem:[#allocation7 + $0x128] ss:$48 sps:$4 sm:$0xff]   ;;  %v5320_v16 = vld [vmem:[#allocation7 + $0x184] ss:$48 sps:$4 sm:$0xff]  }
  0xb7   : > { %1032 = vmatpush1.bf16.msra.mxu0 %v5306_v6  ;;  %1073 = vmatpush1.bf16.msra.mxu1 %v5307_v7  ;;  %v5322_v17 = vld [vmem:[#allocation7 + $0x18c] ss:$48 sps:$4 sm:$0xff]   ;;  %v5324_v18 = vld [vmem:[#allocation7 + $0x180] ss:$48 sps:$4 sm:$0xff]   ;;  %v5325_v19 = vld [vmem:[#allocation7 + $0x188] ss:$48 sps:$4 sm:$0xff]  }
  0xb8   : > { %1033 = vmatprep.subr.bf16.mxu0 %v5308_v8  ;;  %1074 = vmatprep.subr.bf16.mxu1 %v5310_v9  ;;  %v5326_v21 = vld [vmem:[#allocation7 + $0x1e4] ss:$48 sps:$4 sm:$0xff]   ;;  %v5328_v22 = vld [vmem:[#allocation7 + $0x1ec] ss:$48 sps:$4 sm:$0xff]   ;;  %v5330_v23 = vld [vmem:[#allocation7 + $0x1e0] ss:$48 sps:$4 sm:$0xff]  }
  0xb9   : > { %v6383_v24 = vshrl.u32 %v301_v20, 7  ;;  %v5331_v25 = vld [vmem:[#allocation7 + $0x1e8] ss:$48 sps:$4 sm:$0xff]   ;;  %v5332_v26 = vld [vmem:[#allocation7 + $0x244] ss:$48 sps:$4 sm:$0xff]   ;;  %vm3501_vm1 = vcmask 850944  }
  0xba   : > { %v5334_v27 = vld [vmem:[#allocation7 + $0x24c] ss:$48 sps:$4 sm:$0xff]   ;;  %v5336_v28 = vld [vmem:[#allocation7 + $0x240] ss:$48 sps:$4 sm:$0xff]   ;;  %v5337_v29 = vld [vmem:[#allocation7 + $0x248] ss:$48 sps:$4 sm:$0xff]  }
  0xbb   : > { %1034 = vmatpush1.bf16.msra.mxu0 %v5312_v10  ;;  %1075 = vmatpush1.bf16.msra.mxu1 %v5313_v11  ;;  %v6386_v30 = vsub.s32 1, %v6383_v24  ;;  %v298_v31 = vld [vmem:[#allocation2] sm:$0x3]  ;;  %v5338_v32 = vld [vmem:[#allocation7 + $0x2a4] ss:$48 sps:$4 sm:$0xff]   ;;  %v6389_v36 = vsub.s32 0, %v6383_v24 }
  0xbc   : > { %1035 = vmatprep.subr.bf16.mxu0 %v5314_v12  ;;  %1076 = vmatprep.subr.bf16.mxu1 %v5316_v13  ;;  %v5340_v33 = vld [vmem:[#allocation7 + $0x2ac] ss:$48 sps:$4 sm:$0xff]   ;;  %v299_v34 = vmax.f32 %v298_v31, 0.0  ;;  %v5342_v35 = vld [vmem:[#allocation7 + $0x2a0] ss:$48 sps:$4 sm:$0xff]   ;;  %vm3514_vm2 = vcmask 1043456  }
  0xbd   : > { %v5343_v38 = vld [vmem:[#allocation7 + $0x2a8] ss:$48 sps:$4 sm:$0xff]   ;;  %v5344_v39 = vld [vmem:[#allocation7 + $0x304] ss:$48 sps:$4 sm:$0xff]   ;;  %v5346_v40 = vld [vmem:[#allocation7 + $0x30c] ss:$48 sps:$4 sm:$0xff]  }
  0xbe   : > { %v308_v37 = vrot.slane %v299_v34, %v6386_v30  ;;  %v5348_v42 = vld [vmem:[#allocation7 + $0x300] ss:$48 sps:$4 sm:$0xff]   ;;  %v304_v43 = vrot.slane %v299_v34, %v6389_v36  ;;  %v5349_v44 = vld [vmem:[#allocation7 + $0x308] ss:$48 sps:$4 sm:$0xff]   ;;  %v5352_v45 = vld [vmem:[#allocation7 + $0x14] ss:$48 sps:$4 sm:$0xff]  }
  0xbf   : > { %1036 = vmatpush1.bf16.msra.mxu0 %v5318_v14  ;;  %1077 = vmatpush1.bf16.msra.mxu1 %v5319_v15  ;;  %v5350_v47 = vld [vmem:[#allocation7 + $0x10] ss:$48 sps:$4 sm:$0xff]   ;;  %v5355_v48 = vld [vmem:[#allocation7 + $0x74] ss:$48 sps:$4 sm:$0xff]   ;;  %v5379_v49 = vld [vmem:[#allocation7 + $0x1c] ss:$48 sps:$4 sm:$0xff]  }
  0xc0   : > { %1037 = vmatprep.subr.bf16.mxu0 %v5320_v16  ;;  %1078 = vmatprep.subr.bf16.mxu1 %v5322_v17  ;;  %v6392_v41 = vpack.c.bf16 %v308_v37, %v308_v37  ;;  %v6399_v46 = vpack.c.bf16 %v304_v43, %v304_v43  ;;  %v5377_v50 = vld [vmem:[#allocation7 + $0x18] ss:$48 sps:$4 sm:$0xff]   ;;  %v5382_v51 = vld [vmem:[#allocation7 + $0x7c] ss:$48 sps:$4 sm:$0xff]   ;;  %v5353_v52 = vld [vmem:[#allocation7 + $0x70] ss:$48 sps:$4 sm:$0xff]  }
  0xc1   : > { %v5358_v53 = vld [vmem:[#allocation7 + $0xd4] ss:$48 sps:$4 sm:$0xff]   ;;  %v5380_v54 = vld [vmem:[#allocation7 + $0x78] ss:$48 sps:$4 sm:$0xff]   ;;  %v5385_v55 = vld [vmem:[#allocation7 + $0xdc] ss:$48 sps:$4 sm:$0xff]  }
  0xc2   : > { %4601 = vmatprep.mubr.msk.bf16.mxu0 %vm1025_vm0, %v6392_v41  ;;  %4602 = vmatprep.mubr.msk.bf16.mxu1 %vm1025_vm0, %v6392_v41  ;;  %v5356_v56 = vld [vmem:[#allocation7 + $0xd0] ss:$48 sps:$4 sm:$0xff]   ;;  %v5361_v57 = vld [vmem:[#allocation7 + $0x134] ss:$48 sps:$4 sm:$0xff]   ;;  %v5383_v58 = vld [vmem:[#allocation7 + $0xd8] ss:$48 sps:$4 sm:$0xff]  }
  0xc3   : > { %1038 = vmatpush1.bf16.msra.mxu0 %v5324_v18  ;;  %1079 = vmatpush1.bf16.msra.mxu1 %v5325_v19  ;;  %v5388_v59 = vld [vmem:[#allocation7 + $0x13c] ss:$48 sps:$4 sm:$0xff]   ;;  %v5359_v60 = vld [vmem:[#allocation7 + $0x130] ss:$48 sps:$4 sm:$0xff]   ;;  %v5364_v61 = vld [vmem:[#allocation7 + $0x194] ss:$48 sps:$4 sm:$0xff]  }
  0xc4   : > { %1039 = vmatprep.subr.bf16.mxu0 %v5326_v21  ;;  %1080 = vmatprep.subr.bf16.mxu1 %v5328_v22  ;;  %v5386_v62 = vld [vmem:[#allocation7 + $0x138] ss:$48 sps:$4 sm:$0xff]   ;;  %v5391_v63 = vld [vmem:[#allocation7 + $0x19c] ss:$48 sps:$4 sm:$0xff]   ;;  %v5362_v0 = vld [vmem:[#allocation7 + $0x190] ss:$48 sps:$4 sm:$0xff]  }
  0xc5   : > { %v5367_v1 = vld [vmem:[#allocation7 + $0x1f4] ss:$48 sps:$4 sm:$0xff]   ;;  %v5389_v2 = vld [vmem:[#allocation7 + $0x198] ss:$48 sps:$4 sm:$0xff]   ;;  %v5394_v3 = vld [vmem:[#allocation7 + $0x1fc] ss:$48 sps:$4 sm:$0xff]  }
  0xc6   : > { %v5365_v4 = vld [vmem:[#allocation7 + $0x1f0] ss:$48 sps:$4 sm:$0xff]   ;;  %v5370_v5 = vld [vmem:[#allocation7 + $0x254] ss:$48 sps:$4 sm:$0xff]   ;;  %v5392_v6 = vld [vmem:[#allocation7 + $0x1f8] ss:$48 sps:$4 sm:$0xff]  }
  0xc7   : > { %1040 = vmatpush1.bf16.msra.mxu0 %v5330_v23  ;;  %1081 = vmatpush1.bf16.msra.mxu1 %v5331_v25  ;;  %v5397_v7 = vld [vmem:[#allocation7 + $0x25c] ss:$48 sps:$4 sm:$0xff]   ;;  %v5368_v8 = vld [vmem:[#allocation7 + $0x250] ss:$48 sps:$4 sm:$0xff]   ;;  %v5373_v9 = vld [vmem:[#allocation7 + $0x2b4] ss:$48 sps:$4 sm:$0xff]  }
  0xc8   : > { %1041 = vmatprep.subr.bf16.mxu0 %v5332_v26  ;;  %1082 = vmatprep.subr.bf16.mxu1 %v5334_v27  ;;  %v5395_v10 = vld [vmem:[#allocation7 + $0x258] ss:$48 sps:$4 sm:$0xff]   ;;  %v5400_v11 = vld [vmem:[#allocation7 + $0x2bc] ss:$48 sps:$4 sm:$0xff]   ;;  %v5371_v12 = vld [vmem:[#allocation7 + $0x2b0] ss:$48 sps:$4 sm:$0xff]  }
  0xc9   : > { %v5376_v13 = vld [vmem:[#allocation7 + $0x314] ss:$48 sps:$4 sm:$0xff]   ;;  %v5398_v14 = vld [vmem:[#allocation7 + $0x2b8] ss:$48 sps:$4 sm:$0xff]   ;;  %v5403_v15 = vld [vmem:[#allocation7 + $0x31c] ss:$48 sps:$4 sm:$0xff]  }
  0xca   : > { %v5374_v16 = vld [vmem:[#allocation7 + $0x310] ss:$48 sps:$4 sm:$0xff]   ;;  %v5406_v17 = vld [vmem:[#allocation7 + $0x24] ss:$48 sps:$4 sm:$0xff]   ;;  %v5401_v18 = vld [vmem:[#allocation7 + $0x318] ss:$48 sps:$4 sm:$0xff]  }
  0xcb   : > { %1042 = vmatpush1.bf16.msra.mxu0 %v5336_v28  ;;  %1083 = vmatpush1.bf16.msra.mxu1 %v5337_v29  ;;  %v5424_v19 = vld [vmem:[#allocation7 + $0x2c] ss:$48 sps:$4 sm:$0xff]   ;;  %v5404_v20 = vld [vmem:[#allocation7 + $0x20] ss:$48 sps:$4 sm:$0xff]   ;;  %v5409_v21 = vld [vmem:[#allocation7 + $0x84] ss:$48 sps:$4 sm:$0xff]  }
  0xcc   : > { %1043 = vmatprep.subr.bf16.mxu0 %v5338_v32  ;;  %1084 = vmatprep.subr.bf16.mxu1 %v5340_v33  ;;  %v5422_v22 = vld [vmem:[#allocation7 + $0x28] ss:$48 sps:$4 sm:$0xff]   ;;  %v5430_v23 = vld [vmem:[#allocation7 + $0x8c] ss:$48 sps:$4 sm:$0xff]   ;;  %v5407_v25 = vld [vmem:[#allocation7 + $0x80] ss:$48 sps:$4 sm:$0xff]  }
  0xcd   : > { %v5412_v26 = vld [vmem:[#allocation7 + $0xe4] ss:$48 sps:$4 sm:$0xff]   ;;  %v5428_v27 = vld [vmem:[#allocation7 + $0x88] ss:$48 sps:$4 sm:$0xff]   ;;  %v5436_v28 = vld [vmem:[#allocation7 + $0xec] ss:$48 sps:$4 sm:$0xff]  }
  0xce   : > { %v5410_v29 = vld [vmem:[#allocation7 + $0xe0] ss:$48 sps:$4 sm:$0xff]   ;;  %v5415_v31 = vld [vmem:[#allocation7 + $0x144] ss:$48 sps:$4 sm:$0xff]   ;;  %v5434_v32 = vld [vmem:[#allocation7 + $0xe8] ss:$48 sps:$4 sm:$0xff]  }
  0xcf   : > { %1044 = vmatpush1.bf16.msra.mxu0 %v5342_v35  ;;  %1085 = vmatpush1.bf16.msra.mxu1 %v5343_v38  ;;  %v5442_v33 = vld [vmem:[#allocation7 + $0x14c] ss:$48 sps:$4 sm:$0xff]   ;;  %v5413_v34 = vld [vmem:[#allocation7 + $0x140] ss:$48 sps:$4 sm:$0xff]   ;;  %v5418_v35 = vld [vmem:[#allocation7 + $0x1a4] ss:$48 sps:$4 sm:$0xff]  }
  0xd0   : > { %1045 = vmatprep.subr.bf16.mxu0 %v5344_v39  ;;  %1086 = vmatprep.subr.bf16.mxu1 %v5346_v40  ;;  %v5440_v37 = vld [vmem:[#allocation7 + $0x148] ss:$48 sps:$4 sm:$0xff]   ;;  %v5445_v38 = vld [vmem:[#allocation7 + $0x1ac] ss:$48 sps:$4 sm:$0xff]   ;;  %v5416_v39 = vld [vmem:[#allocation7 + $0x1a0] ss:$48 sps:$4 sm:$0xff]  }
  0xd1   : > { %v5421_v40 = vld [vmem:[#allocation7 + $0x204] ss:$48 sps:$4 sm:$0xff]   ;;  %s5198_s29 = smul.u32 168, %s6374_s11  ;;  %p7202_p2 = scmp.ne.s32.totalorder %s7184_s30, 0 }
  0xd2   : > { %v5427_v43 = vld [vmem:[#allocation7 + $0x264] ss:$48 sps:$4 sm:$0xff]   ;;  %s4917_s10 = smul.u32 384, %s6174_s22  ;;  %s4356_s22 = scalar_lea.sflag [#allocation4], %s6374_s11 }
  0xd3   : > { %1046 = vmatpush1.bf16.msra.mxu0 %v5348_v42  ;;  %1087 = vmatpush1.bf16.msra.mxu1 %v5349_v44  ;;  %v5443_v42 = vld [vmem:[#allocation7 + $0x1a8] ss:$48 sps:$4 sm:$0xff]   ;;  %v5448_v44 = vld [vmem:[#allocation7 + $0x20c] ss:$48 sps:$4 sm:$0xff]   ;;  %s7077_s26 = scalar_lea.vmem [#allocation11], %s5198_s29  ;;  %s6119_s13 = smov [#allocation11]  }
  0xd4   : > { %1111 = vmatprep.subr.bf16.mxu0 %v5352_v45  ;;  %1152 = vmatprep.subr.bf16.mxu1 %v5379_v49  ;;  %v5446_v45 = vld [vmem:[#allocation7 + $0x208] ss:$48 sps:$4 sm:$0xff]   ;;  %v5433_v49 = vld [vmem:[#allocation7 + $0x2c4] ss:$48 sps:$4 sm:$0xff]   ;;  %s4369_s28 = sshll.u32 %s7077_s26, 4  ;;  %s7116_s17 = scalar_lea.hbm %s7169_s5, %s4917_s10  ;;  %s7118_s28 = int_to_ptr.vmem [resolvable:$true] %s4369_s28 }
  0xd5   : > { %s6027_s9 = scalar_lea.vmem %s7118_s28, 2688  ;;  %s6031_s23 = sshll.u32 %s6119_s13, 4  ;;  %s6032_s23 = int_to_ptr.vmem [resolvable:$false] %s6031_s23 }
  0xd6   : > { %1062 = vmatmul.mubr.bf16.vlgmr.msra.gmra.mrb[0].mxu0 %v6399_v46  ;;  %1103 = vmatmul.mubr.bf16.vlgmr.msra.gmra.mrb[0].mxu1 %v6399_v46  ;;  %p6028_p1 = scmp.ne.s32.totalorder %s7118_s28, %s6027_s9  ;;  %s6033_s16 = scalar_lea.vmem %s6032_s23, 5376 }
  0xd7   : > { %1112 = vmatpush1.bf16.msra.mxu0 %v5350_v47  ;;  %4603 = vmatprep.mubr.msk.bf16.mxu0 %vm1025_vm0, %v6392_v41  ;;  %v5451_v47 = vld [vmem:[#allocation7 + $0x26c] ss:$48 sps:$4 sm:$0xff]   ;;  %p6034_p11 = scmp.lt.s32.totalorder %s7118_s28, %s6032_s23  ;;  %p6035_p12 = scmp.lt.s32.totalorder %s6033_s16, %s6027_s9 }
  0xd8   : > { %1113 = vmatprep.subr.bf16.mxu0 %v5355_v48  ;;  %1153 = vmatpush1.bf16.msra.mxu1 %v5377_v50  ;;  %v5425_v48 = vld [vmem:[#allocation7 + $0x260] ss:$48 sps:$4 sm:$0xff]   ;;  %v5449_v50 = vld [vmem:[#allocation7 + $0x268] ss:$48 sps:$4 sm:$0xff]   ;;  %p6029_p8 = pnand %p6028_p1, %p7202_p2 }
  0xd9   : > { %4604 = vmatprep.mubr.msk.bf16.mxu1 %vm1025_vm0, %v6392_v41  ;;  %1154 = vmatprep.subr.bf16.mxu1 %v5382_v51  ;;  %v5454_v51 = vld [vmem:[#allocation7 + $0x2cc] ss:$48 sps:$4 sm:$0xff]   ;;  %p6036_p4 = por %p6035_p12, %p6034_p11 }
  0xda   : > { %p6030_p7 = pneg %p6029_p8 }
  0xdb   : > { %1114 = vmatpush1.bf16.msra.mxu0 %v5353_v52  ;;  %v5431_v52 = vld [vmem:[#allocation7 + $0x2c0] ss:$48 sps:$4 sm:$0xff]  }
  0xdc   : > { %1115 = vmatprep.subr.bf16.mxu0 %v5358_v53  ;;  %1155 = vmatpush1.bf16.msra.mxu1 %v5380_v54  ;;  %v5439_v53 = vld [vmem:[#allocation7 + $0x324] ss:$48 sps:$4 sm:$0xff]   ;;  %v5452_v54 = vld [vmem:[#allocation7 + $0x2c8] ss:$48 sps:$4 sm:$0xff]   ;;  %p6037_p6 = pnand %p6036_p4, %p6030_p7 }
  0xdd   : > { %1156 = vmatprep.subr.bf16.mxu1 %v5385_v55  ;;  %v5457_v55 = vld [vmem:[#allocation7 + $0x32c] ss:$48 sps:$4 sm:$0xff]  }
  0xdf   : > { %1116 = vmatpush1.bf16.msra.mxu0 %v5356_v56  ;;  %v5437_v56 = vld [vmem:[#allocation7 + $0x320] ss:$48 sps:$4 sm:$0xff]  }
  0xe0   : > { %1117 = vmatprep.subr.bf16.mxu0 %v5361_v57  ;;  %1157 = vmatpush1.bf16.msra.mxu1 %v5383_v58  ;;  %v5463_v57 = vld [vmem:[%s6377_s14 + $0x184] ss:$12 sps:$4 sm:$0xff]  }
  0xe1   : > { %1158 = vmatprep.subr.bf16.mxu1 %v5388_v59  ;;  %v5455_v58 = vld [vmem:[#allocation7 + $0x328] ss:$48 sps:$4 sm:$0xff]  }
  0xe2   : > { %v5460_v59 = vld [vmem:[%s6377_s14 + $0x4] ss:$12 sps:$4 sm:$0xff]  }
  0xe3   : > { %1118 = vmatpush1.bf16.msra.mxu0 %v5359_v60  ;;  %v5461_v60 = vld [vmem:[%s6377_s14 + $0x180] ss:$12 sps:$4 sm:$0xff]  }
  0xe4   : > { %1119 = vmatprep.subr.bf16.mxu0 %v5364_v61  ;;  %1159 = vmatpush1.bf16.msra.mxu1 %v5386_v62  ;;  %v5469_v61 = vld [vmem:[%s6377_s14 + $0x19c] ss:$12 sps:$4 sm:$0xff]   ;;  %v5458_v62 = vld [vmem:[%s6377_s14] ss:$12 sps:$4 sm:$0xff]  }
  0xe5   : > { %1160 = vmatprep.subr.bf16.mxu1 %v5391_v63  ;;  %v5466_v63 = vld [vmem:[%s6377_s14 + $0x1c] ss:$12 sps:$4 sm:$0xff]  }
  0xe7   : > { %1120 = vmatpush1.bf16.msra.mxu0 %v5362_v0  ;;  %v5467_v0 = vld [vmem:[%s6377_s14 + $0x198] ss:$12 sps:$4 sm:$0xff]  }
  0xe8   : > { %1121 = vmatprep.subr.bf16.mxu0 %v5367_v1  ;;  %1161 = vmatpush1.bf16.msra.mxu1 %v5389_v2  ;;  %v5475_v1 = vld [vmem:[%s6377_s14 + $0x1b4] ss:$12 sps:$4 sm:$0xff]   ;;  %v5464_v2 = vld [vmem:[%s6377_s14 + $0x18] ss:$12 sps:$4 sm:$0xff]  }
  0xe9   : > { %1162 = vmatprep.subr.bf16.mxu1 %v5394_v3  ;;  %v5472_v3 = vld [vmem:[%s6377_s14 + $0x34] ss:$12 sps:$4 sm:$0xff]  }
  0xeb   : > { %1122 = vmatpush1.bf16.msra.mxu0 %v5365_v4  ;;  %v5473_v4 = vld [vmem:[%s6377_s14 + $0x1b0] ss:$12 sps:$4 sm:$0xff]  }
  0xec   : > { %1123 = vmatprep.subr.bf16.mxu0 %v5370_v5  ;;  %1163 = vmatpush1.bf16.msra.mxu1 %v5392_v6  ;;  %v5481_v5 = vld [vmem:[%s6377_s14 + $0x1cc] ss:$12 sps:$4 sm:$0xff]   ;;  %v5470_v6 = vld [vmem:[%s6377_s14 + $0x30] ss:$12 sps:$4 sm:$0xff]  }
  0xed   : > { %1164 = vmatprep.subr.bf16.mxu1 %v5397_v7  ;;  %v5478_v7 = vld [vmem:[%s6377_s14 + $0x4c] ss:$12 sps:$4 sm:$0xff]  }
  0xef   : > { %1124 = vmatpush1.bf16.msra.mxu0 %v5368_v8  ;;  %v5479_v8 = vld [vmem:[%s6377_s14 + $0x1c8] ss:$12 sps:$4 sm:$0xff]  }
  0xf0   : > { %1125 = vmatprep.subr.bf16.mxu0 %v5373_v9  ;;  %1165 = vmatpush1.bf16.msra.mxu1 %v5395_v10  ;;  %v5487_v9 = vld [vmem:[%s6377_s14 + $0x1e4] ss:$12 sps:$4 sm:$0xff]  }
  0xf1   : > { %1166 = vmatprep.subr.bf16.mxu1 %v5400_v11  ;;  %v5484_v10 = vld [vmem:[%s6377_s14 + $0x64] ss:$12 sps:$4 sm:$0xff]   ;;  %v5485_v11 = vld [vmem:[%s6377_s14 + $0x1e0] ss:$12 sps:$4 sm:$0xff]  }
  0xf3   : > { %1126 = vmatpush1.bf16.msra.mxu0 %v5371_v12  ;;  %v5493_v12 = vld [vmem:[%s6377_s14 + $0x1fc] ss:$12 sps:$4 sm:$0xff]  }
  0xf4   : > { %1127 = vmatprep.subr.bf16.mxu0 %v5376_v13  ;;  %1167 = vmatpush1.bf16.msra.mxu1 %v5398_v14  ;;  %v5482_v13 = vld [vmem:[%s6377_s14 + $0x60] ss:$12 sps:$4 sm:$0xff]   ;;  %v5490_v14 = vld [vmem:[%s6377_s14 + $0x7c] ss:$12 sps:$4 sm:$0xff]  }
  0xf5   : > { %1168 = vmatprep.subr.bf16.mxu1 %v5403_v15  ;;  %v5491_v15 = vld [vmem:[%s6377_s14 + $0x1f8] ss:$12 sps:$4 sm:$0xff]  }
  0xf7   : > { %1128 = vmatpush1.bf16.msra.mxu0 %v5374_v16  ;;  %v5499_v16 = vld [vmem:[%s6377_s14 + $0x214] ss:$12 sps:$4 sm:$0xff]  }
  0xf8   : > { %1193 = vmatprep.subr.bf16.mxu0 %v5406_v17  ;;  %1169 = vmatpush1.bf16.msra.mxu1 %v5401_v18  ;;  %v5488_v17 = vld [vmem:[%s6377_s14 + $0x78] ss:$12 sps:$4 sm:$0xff]   ;;  %v5496_v18 = vld [vmem:[%s6377_s14 + $0x94] ss:$12 sps:$4 sm:$0xff]  }
  0xf9   : > { %1234 = vmatprep.subr.bf16.mxu1 %v5424_v19  ;;  %v5497_v19 = vld [vmem:[%s6377_s14 + $0x210] ss:$12 sps:$4 sm:$0xff]  }
  0xfa   : > { %1144 = vmatmul.mubr.bf16.vlgmr.msra.gmra.mrb[4].mxu0 %v6399_v46 }
  0xfb   : > { %1194 = vmatpush1.bf16.msra.mxu0 %v5404_v20  ;;  %4605 = vmatprep.mubr.msk.bf16.mxu0 %vm1025_vm0, %v6392_v41  ;;  %v5505_v20 = vld [vmem:[%s6377_s14 + $0x22c] ss:$12 sps:$4 sm:$0xff]  }
  0xfc   : > { %1185 = vmatmul.mubr.bf16.vlgmr.msra.gmra.mrb[4].mxu1 %v6399_v46  ;;  %1195 = vmatprep.subr.bf16.mxu0 %v5409_v21  ;;  %v5494_v21 = vld [vmem:[%s6377_s14 + $0x90] ss:$12 sps:$4 sm:$0xff]  }
  0xfd   : > { %1235 = vmatpush1.bf16.msra.mxu1 %v5422_v22  ;;  %4606 = vmatprep.mubr.msk.bf16.mxu1 %vm1025_vm0, %v6392_v41  ;;  %v5419_v41 = vld [vmem:[#allocation7 + $0x200] ss:$48 sps:$4 sm:$0xff]  }
  0xfe   : > { %1236 = vmatprep.subr.bf16.mxu1 %v5430_v23  ;;  %v5502_v22 = vld [vmem:[%s6377_s14 + $0xac] ss:$12 sps:$4 sm:$0xff]   ;;  %v5503_v23 = vld [vmem:[%s6377_s14 + $0x228] ss:$12 sps:$4 sm:$0xff]  }
  0xff   : > { %1196 = vmatpush1.bf16.msra.mxu0 %v5407_v25  ;;  %v5511_v25 = vld [vmem:[%s6377_s14 + $0x244] ss:$12 sps:$4 sm:$0xff]  }
 0x100   : > { %1197 = vmatprep.subr.bf16.mxu0 %v5412_v26  ;;  %v5500_v26 = vld [vmem:[%s6377_s14 + $0xa8] ss:$12 sps:$4 sm:$0xff]  }
 0x101   : > { %1237 = vmatpush1.bf16.msra.mxu1 %v5428_v27  ;;  %v5508_v27 = vld [vmem:[%s6377_s14 + $0xc4] ss:$12 sps:$4 sm:$0xff]  }
 0x102   : > { %1238 = vmatprep.subr.bf16.mxu1 %v5436_v28  ;;  %v5509_v28 = vld [vmem:[%s6377_s14 + $0x240] ss:$12 sps:$4 sm:$0xff]  }
 0x103   : > { %1198 = vmatpush1.bf16.msra.mxu0 %v5410_v29  ;;  %v5517_v29 = vld [vmem:[%s6377_s14 + $0x25c] ss:$12 sps:$4 sm:$0xff]  }
 0x104   : > { %1199 = vmatprep.subr.bf16.mxu0 %v5415_v31  ;;  %v5506_v31 = vld [vmem:[%s6377_s14 + $0xc0] ss:$12 sps:$4 sm:$0xff]  }
 0x105   : > { %1239 = vmatpush1.bf16.msra.mxu1 %v5434_v32  ;;  %v5514_v32 = vld [vmem:[%s6377_s14 + $0xdc] ss:$12 sps:$4 sm:$0xff]  }
 0x106   : > { %1240 = vmatprep.subr.bf16.mxu1 %v5442_v33  ;;  %v5515_v33 = vld [vmem:[%s6377_s14 + $0x258] ss:$12 sps:$4 sm:$0xff]  }
 0x107   : > { %1200 = vmatpush1.bf16.msra.mxu0 %v5413_v34  ;;  %v5523_v34 = vld [vmem:[%s6377_s14 + $0x274] ss:$12 sps:$4 sm:$0xff]  }
 0x108   : > { %1201 = vmatprep.subr.bf16.mxu0 %v5418_v35  ;;  %v5512_v35 = vld [vmem:[%s6377_s14 + $0xd8] ss:$12 sps:$4 sm:$0xff]  }
 0x109   : > { %1241 = vmatpush1.bf16.msra.mxu1 %v5440_v37  ;;  %v5520_v37 = vld [vmem:[%s6377_s14 + $0xf4] ss:$12 sps:$4 sm:$0xff]  }
 0x10a   : > { %1242 = vmatprep.subr.bf16.mxu1 %v5445_v38  ;;  %v5521_v38 = vld [vmem:[%s6377_s14 + $0x270] ss:$12 sps:$4 sm:$0xff]  }
 0x10b   : > { %1202 = vmatpush1.bf16.msra.mxu0 %v5416_v39  ;;  %v5529_v39 = vld [vmem:[%s6377_s14 + $0x28c] ss:$12 sps:$4 sm:$0xff]  }
 0x10c   : > { %1203 = vmatprep.subr.bf16.mxu0 %v5421_v40  ;;  %v5518_v40 = vld [vmem:[%s6377_s14 + $0xf0] ss:$12 sps:$4 sm:$0xff]  }
 0x10d   : > { %1243 = vmatpush1.bf16.msra.mxu1 %v5443_v42  ;;  %v5527_v42 = vld [vmem:[%s6377_s14 + $0x288] ss:$12 sps:$4 sm:$0xff]  }
 0x10e   : > { %1244 = vmatprep.subr.bf16.mxu1 %v5448_v44  ;;  %v5524_v44 = vld [vmem:[%s6377_s14 + $0x108] ss:$12 sps:$4 sm:$0xff]  }
 0x10f   : > { %1204 = vmatpush1.bf16.msra.mxu0 %v5419_v41  ;;  %v5526_v41 = vld [vmem:[%s6377_s14 + $0x10c] ss:$12 sps:$4 sm:$0xff]  }
 0x110   : > { %1205 = vmatprep.subr.bf16.mxu0 %v5427_v43  ;;  %v5535_v43 = vld [vmem:[%s6377_s14 + $0x2a4] ss:$12 sps:$4 sm:$0xff]  }
 0x111   : > { %1245 = vmatpush1.bf16.msra.mxu1 %v5446_v45  ;;  %v5532_v45 = vld [vmem:[%s6377_s14 + $0x124] ss:$12 sps:$4 sm:$0xff]  }
 0x112   : > { %1246 = vmatprep.subr.bf16.mxu1 %v5451_v47  ;;  %v5533_v47 = vld [vmem:[%s6377_s14 + $0x2a0] ss:$12 sps:$4 sm:$0xff]  }
 0x113   : > { %1206 = vmatpush1.bf16.msra.mxu0 %v5425_v48  ;;  %v5541_v48 = vld [vmem:[%s6377_s14 + $0x2bc] ss:$12 sps:$4 sm:$0xff]  }
 0x114   : > { %1207 = vmatprep.subr.bf16.mxu0 %v5433_v49  ;;  %v5530_v49 = vld [vmem:[%s6377_s14 + $0x120] ss:$12 sps:$4 sm:$0xff]  }
 0x115   : > { %1247 = vmatpush1.bf16.msra.mxu1 %v5449_v50  ;;  %v5538_v50 = vld [vmem:[%s6377_s14 + $0x13c] ss:$12 sps:$4 sm:$0xff]  }
 0x116   : > { %1248 = vmatprep.subr.bf16.mxu1 %v5454_v51  ;;  %v5539_v51 = vld [vmem:[%s6377_s14 + $0x2b8] ss:$12 sps:$4 sm:$0xff]  }
 0x117   : > { %1208 = vmatpush1.bf16.msra.mxu0 %v5431_v52  ;;  %v5547_v52 = vld [vmem:[%s6377_s14 + $0x2d4] ss:$12 sps:$4 sm:$0xff]  }
 0x118   : > { %1209 = vmatprep.subr.bf16.mxu0 %v5439_v53  ;;  %v5536_v53 = vld [vmem:[%s6377_s14 + $0x138] ss:$12 sps:$4 sm:$0xff]  }
 0x119   : > { %1249 = vmatpush1.bf16.msra.mxu1 %v5452_v54  ;;  %v5544_v54 = vld [vmem:[%s6377_s14 + $0x154] ss:$12 sps:$4 sm:$0xff]  }
 0x11a   : > { %1250 = vmatprep.subr.bf16.mxu1 %v5457_v55  ;;  %v5545_v55 = vld [vmem:[%s6377_s14 + $0x2d0] ss:$12 sps:$4 sm:$0xff]  }
 0x11b   : > { %1210 = vmatpush1.bf16.msra.mxu0 %v5437_v56  ;;  %v5542_v56 = vld [vmem:[%s6377_s14 + $0x150] ss:$12 sps:$4 sm:$0xff]  }
 0x11c   : > { %3595 = vmatprep.subr.bf16.mxu0 %v5463_v57  ;;  %v5553_v57 = vld [vmem:[%s6377_s14 + $0x2ec] ss:$12 sps:$4 sm:$0xff]  }
 0x11d   : > { %1251 = vmatpush1.bf16.msra.mxu1 %v5455_v58  ;;  %v5550_v58 = vld [vmem:[%s6377_s14 + $0x16c] ss:$12 sps:$4 sm:$0xff]  }
 0x11e   : > { %1226 = vmatmul.mubr.bf16.vlgmr.msra.gmra.mrb[8].mxu0 %v6399_v46  ;;  %3524 = vmatprep.subr.bf16.mxu1 %v5460_v59  ;;  %v5551_v59 = vld [vmem:[%s6377_s14 + $0x2e8] ss:$12 sps:$4 sm:$0xff]  }
 0x11f   : > { %3596 = vmatpush1.bf16.msra.mxu0 %v5461_v60  ;;  %v5556_v60 = vld [vmem:[%s6377_s14 + $0x304] ss:$12 sps:$4 sm:$0xff]  }
 0x120   : > { %1267 = vmatmul.mubr.bf16.vlgmr.msra.gmra.mrb[8].mxu1 %v6399_v46  ;;  %3597 = vmatprep.subr.bf16.mxu0 %v5469_v61  ;;  %v5476_v46 = vld [vmem:[%s6377_s14 + $0x48] ss:$12 sps:$4 sm:$0xff]  }
 0x121   : > { %3525 = vmatpush1.bf16.msra.mxu1 %v5458_v62  ;;  %v5548_v61 = vld [vmem:[%s6377_s14 + $0x168] ss:$12 sps:$4 sm:$0xff]  }
 0x122   : > { %3526 = vmatprep.subr.bf16.mxu1 %v5466_v63  ;;  %v5557_v62 = vld [vmem:[%s6377_s14 + $0xc8] ss:$12 sps:$4 sm:$0xff]  }
 0x123   : > { %3598 = vmatpush1.bf16.msra.mxu0 %v5467_v0  ;;  %v6481_v63 = vld [vmem:[#allocation8] sm:$0xff]  ;;  %v975_v0 = vsub.s32 2, %v6383_v24 }
 0x124   : > { %3599 = vmatprep.subr.bf16.mxu0 %v5475_v1  ;;  %v979_v1 = vsub.s32 3, %v6383_v24 }
 0x125   : > { %3527 = vmatpush1.bf16.msra.mxu1 %v5464_v2  ;;  %v968_v2 = vrot.slane %v6481_v63, %v6389_v36 }
 0x126   : > { %3528 = vmatprep.subr.bf16.mxu1 %v5472_v3  ;;  %v976_v3 = vrot.slane %v6481_v63, %v975_v0 }
 0x127   : > { %3600 = vmatpush1.bf16.msra.mxu0 %v5473_v4  ;;  %v972_v4 = vrot.slane %v6481_v63, %v6386_v30 }
 0x128   : > { %3601 = vmatprep.subr.bf16.mxu0 %v5481_v5  ;;  %v980_v5 = vrot.slane %v6481_v63, %v979_v1 }
 0x129   : > { %3529 = vmatpush1.bf16.msra.mxu1 %v5470_v6 }
 0x12a   : > { %3530 = vmatprep.subr.bf16.mxu1 %v5478_v7 }
 0x12b   : > { %3602 = vmatpush1.bf16.msra.mxu0 %v5479_v8 }
 0x12c   : > { %3603 = vmatprep.subr.bf16.mxu0 %v5487_v9 }
 0x12d   : > { %3531 = vmatpush1.bf16.msra.mxu1 %v5476_v46 }
 0x12e   : > { %3532 = vmatprep.subr.bf16.mxu1 %v5484_v10 }
 0x12f   : > { %3604 = vmatpush1.bf16.msra.mxu0 %v5485_v11 }
 0x130   : > { %3605 = vmatprep.subr.bf16.mxu0 %v5493_v12 }
 0x131   : > { %3533 = vmatpush1.bf16.msra.mxu1 %v5482_v13 }
 0x132   : > { %3534 = vmatprep.subr.bf16.mxu1 %v5490_v14 }
 0x133   : > { %3606 = vmatpush1.bf16.msra.mxu0 %v5491_v15 }
 0x134   : > { %3607 = vmatprep.subr.bf16.mxu0 %v5499_v16 }
 0x135   : > { %3535 = vmatpush1.bf16.msra.mxu1 %v5488_v17 }
 0x136   : > { %3536 = vmatprep.subr.bf16.mxu1 %v5496_v18 }
 0x137   : > { %3608 = vmatpush1.bf16.msra.mxu0 %v5497_v19 }
 0x138   : > { %3609 = vmatprep.subr.bf16.mxu0 %v5505_v20 }
 0x139   : > { %3537 = vmatpush1.bf16.msra.mxu1 %v5494_v21 }
 0x13a   : > { %3538 = vmatprep.subr.bf16.mxu1 %v5502_v22 }
 0x13b   : > { %3610 = vmatpush1.bf16.msra.mxu0 %v5503_v23 }
 0x13c   : > { %3611 = vmatprep.subr.bf16.mxu0 %v5511_v25 }
 0x13d   : > { %3539 = vmatpush1.bf16.msra.mxu1 %v5500_v26 }
 0x13e   : > { %3540 = vmatprep.subr.bf16.mxu1 %v5508_v27 }
 0x13f   : > { %3612 = vmatpush1.bf16.msra.mxu0 %v5509_v28 }
 0x140   : > { %3613 = vmatprep.subr.bf16.mxu0 %v5517_v29 }
 0x141   : > { %3541 = vmatpush1.bf16.msra.mxu1 %v5506_v31 }
 0x142   : > { %3542 = vmatprep.subr.bf16.mxu1 %v5514_v32  ;;  %v1347_v32 = vld [vmem:[#allocation5] sm:$0xff] }
 0x143   : > { %3614 = vmatpush1.bf16.msra.mxu0 %v5515_v33  ;;  %v1359_v33 = vld [vmem:[#allocation5 + $0x60] sm:$0xff] }
 0x144   : > { %3615 = vmatprep.subr.bf16.mxu0 %v5523_v34 }
 0x145   : > { %3543 = vmatpush1.bf16.msra.mxu1 %v5512_v35 }
 0x146   : > { %3544 = vmatprep.subr.bf16.mxu1 %v5520_v37  ;;  %v1348_v37 = vld [vmem:[#allocation5 + $0x8] sm:$0xff] }
 0x147   : > { %3616 = vmatpush1.bf16.msra.mxu0 %v5521_v38  ;;  %v1349_v38 = vld [vmem:[#allocation5 + $0x10] sm:$0xff] }
 0x148   : > { %3617 = vmatprep.subr.bf16.mxu0 %v5529_v39 }
 0x149   : > { %3545 = vmatpush1.bf16.msra.mxu1 %v5518_v40 }
 0x14a   : > { %3546 = vmatprep.subr.bf16.mxu1 %v5526_v41  ;;  %v1360_v41 = vld [vmem:[#allocation5 + $0x68] sm:$0xff] }
 0x14b   : > { %3618 = vmatpush1.bf16.msra.mxu0 %v5527_v42  ;;  %v1350_v42 = vld [vmem:[#allocation5 + $0x18] sm:$0xff] }
 0x14c   : > { %3619 = vmatprep.subr.bf16.mxu0 %v5535_v43  ;;  %v1361_v43 = vld [vmem:[#allocation5 + $0x70] sm:$0xff] }
 0x14d   : > { %3547 = vmatpush1.bf16.msra.mxu1 %v5524_v44 }
 0x14e   : > { %3548 = vmatprep.subr.bf16.mxu1 %v5532_v45 }
 0x14f   : > { %3620 = vmatpush1.bf16.msra.mxu0 %v5533_v47  ;;  %v1362_v47 = vld [vmem:[#allocation5 + $0x78] sm:$0xff] }
 0x150   : > { %3621 = vmatprep.subr.bf16.mxu0 %v5541_v48 }
 0x151   : > { %3549 = vmatpush1.bf16.msra.mxu1 %v5530_v49 }
 0x152   : > { %3550 = vmatprep.subr.bf16.mxu1 %v5538_v50  ;;  %v1374_v50 = vld [vmem:[#allocation5 + $0xd8] sm:$0xff] }
 0x153   : > { %3622 = vmatpush1.bf16.msra.mxu0 %v5539_v51  ;;  %v1372_v51 = vld [vmem:[#allocation5 + $0xc8] sm:$0xff] }
 0x154   : > { %3623 = vmatprep.subr.bf16.mxu0 %v5547_v52 }
 0x155   : > { %3551 = vmatpush1.bf16.msra.mxu1 %v5536_v53 }
 0x156   : > { %3552 = vmatprep.subr.bf16.mxu1 %v5544_v54  ;;  %v1386_v54 = vld [vmem:[#allocation5 + $0x138] sm:$0xff] }
 0x157   : > { %3624 = vmatpush1.bf16.msra.mxu0 %v5545_v55  ;;  %v1384_v55 = vld [vmem:[#allocation5 + $0x128] sm:$0xff] }
 0x158   : > { %3625 = vmatprep.subr.bf16.mxu0 %v5553_v57 }
 0x159   : > { %3553 = vmatpush1.bf16.msra.mxu1 %v5542_v56 }
 0x15a   : > { %3554 = vmatprep.subr.bf16.mxu1 %v5550_v58 }
 0x15b   : > { %3626 = vmatpush1.bf16.msra.mxu0 %v5551_v59 }
 0x15c   : > { %3666 = vmatprep.subr.bf16.mxu0 %v5556_v60 }
 0x15d   : > { %3555 = vmatpush1.bf16.msra.mxu1 %v5548_v61 }
 0x15e   : > { %4918 = vmatprep.subr.bf16.mxu1 %v5557_v62 }
 0x1a9   : > { %v1063_v6 = vpop.f32.mrb[0].mxu0  ;;  %v1104_v7 = vpop.f32.mrb[0].mxu1 }
 0x1aa   : > { %v1064_v8 = vadd.f32 %v1063_v6, %v968_v2  ;;  %v1105_v46 = vadd.f32 %v1104_v7, %v976_v3  ;;  %v1065_v9 = vpop.f32.mrb[1].mxu0  ;;  %v1106_v10 = vpop.f32.mrb[1].mxu1  ;;  %v1371_v3 = vld [vmem:[#allocation5 + $0xc0] sm:$0xff] }
 0x1ab   : > { %v1066_v11 = vadd.f32 %v1065_v9, %v972_v4  ;;  %v1107_v12 = vadd.f32 %v1106_v10, %v980_v5  ;;  %v1108_v13 = vpop.f32.mrb[2].mxu1  ;;  %v1067_v14 = vpop.f32.mrb[2].mxu0  ;;  %v1383_v4 = vld [vmem:[#allocation5 + $0x120] sm:$0xff]  ;;  %v5554_v10 = vld [vmem:[%s6377_s14 + $0x300] ss:$12 sps:$4 sm:$0xff]  }
 0x1ac   : > { %v4607_v15 = vmul.f32 -1.442695, %v1064_v8  ;;  %v4609_v16 = vmul.f32 -1.442695, %v1105_v46  ;;  %v1109_v17 = vpop.f32.mrb[3].mxu1  ;;  %v1068_v18 = vpop.f32.mrb[3].mxu0 }
 0x1ad   : > { %v4608_v19 = vmul.f32 -1.442695, %v1066_v11  ;;  %v4610_v20 = vmul.f32 -1.442695, %v1107_v12  ;;  %v5558_v6 = vld [vmem:[%s6377_s14 + $0x8] ss:$12 sps:$4 sm:$0xff]  }
 0x1ae   : > { %5837 = vpow2.f32 %v4607_v15  ;;  %v987_v46 = vsub.s32 5, %v6383_v24  ;;  %v5561_v13 = vld [vmem:[%s6377_s14 + $0x31c] ss:$12 sps:$4 sm:$0xff]   ;;  %v5562_v14 = vld [vmem:[%s6377_s14 + $0xe0] ss:$12 sps:$4 sm:$0xff]  }
 0x1af   : > { %5839 = vpow2.f32 %v4609_v16  ;;  %v1373_v17 = vld [vmem:[#allocation5 + $0xd0] sm:$0xff] }
 0x1b0   : > { %5841 = vpow2.f32 %v4608_v19 }
 0x1b1   : > { %5843 = vpow2.f32 %v4610_v20 }
 0x1b8   : > { %v5838_v21 = vpop.eup %5837 }
 0x1b9   : > { %v5840_v22 = vpop.eup %5839  ;;  %v1311_v23 = vadd.f32 1.0, %v5838_v21  ;;  %v1385_v21 = vld [vmem:[#allocation5 + $0x130] sm:$0xff] }
 0x1ba   : > { %v5842_v25 = vpop.eup %5841  ;;  %v1313_v26 = vadd.f32 1.0, %v5840_v22  ;;  %v1398_v22 = vld [vmem:[#allocation5 + $0x198] sm:$0xff] }
 0x1bb   : > { %v5844_v27 = vpop.eup %5843  ;;  %5845 = vrcp.f32 %v1311_v23  ;;  %v1312_v28 = vadd.f32 1.0, %v5842_v25  ;;  %v1410_v23 = vld [vmem:[#allocation5 + $0x1f8] sm:$0xff] }
 0x1bc   : > { %5847 = vrcp.f32 %v1313_v26  ;;  %v1314_v29 = vadd.f32 1.0, %v5844_v27  ;;  %v5563_v27 = vld [vmem:[%s6377_s14 + $0x20] ss:$12 sps:$4 sm:$0xff]  }
 0x1bd   : > { %5849 = vrcp.f32 %v1312_v28  ;;  %v1396_v28 = vld [vmem:[#allocation5 + $0x188] sm:$0xff] }
 0x1be   : > { %5851 = vrcp.f32 %v1314_v29  ;;  %v1408_v29 = vld [vmem:[#allocation5 + $0x1e8] sm:$0xff] }
 0x1c5   : > { %v5846_v31 = vpop.eup %5845 }
 0x1c6   : > { %v5848_v34 = vpop.eup %5847  ;;  %v6496_v35 = vrot.slane %v5846_v31, %v6389_v36  ;;  %v988_v31 = vrot.slane %v6481_v63, %v987_v46  ;;  %v5573_v46 = vld [vmem:[%s6377_s14 + $0x50] ss:$12 sps:$4 sm:$0xff]  }
 0x1c7   : > { %v5850_v39 = vpop.eup %5849  ;;  %v6499_v40 = vrot.slane %v5848_v34, %v6389_v36  ;;  %v5559_v34 = vld [vmem:[%s6377_s14 + $0x318] ss:$12 sps:$4 sm:$0xff]  }
 0x1c8   : > { %v5852_v44 = vpop.eup %5851  ;;  %v6502_v45 = vrot.slane %v5850_v39, %v6389_v36  ;;  %v1479_v48 = vmul.f32 %v6496_v35, %v1347_v32  ;;  %v1491_v49 = vmul.f32 %v6496_v35, %v1359_v33  ;;  %v1503_v15 = vmul.f32 %v6496_v35, %v1371_v3  ;;  %v5566_v39 = vld [vmem:[%s6377_s14 + $0x334] ss:$12 sps:$4 sm:$0xff]  }
 0x1c9   : > { %v6507_v52 = vrot.slane %v5852_v44, %v6389_v36  ;;  %v1481_v53 = vmul.f32 %v6499_v40, %v1349_v38  ;;  %v1493_v59 = vmul.f32 %v6499_v40, %v1361_v43  ;;  %v1515_v16 = vmul.f32 %v6496_v35, %v1383_v4 }
 0x1ca   : > { %v1480_v56 = vmul.f32 %v6502_v45, %v1348_v37  ;;  %v1492_v57 = vmul.f32 %v6502_v45, %v1360_v41  ;;  %v6512_v58 = vpack.c.bf16 %v1491_v49, %v1479_v48  ;;  %v1504_v2 = vmul.f32 %v6502_v45, %v1372_v51  ;;  %v5567_v37 = vld [vmem:[%s6377_s14 + $0xf8] ss:$12 sps:$4 sm:$0xff]  }
 0x1cb   : > { %v1482_v60 = vmul.f32 %v6507_v52, %v1350_v42  ;;  %v1494_v61 = vmul.f32 %v6507_v52, %v1362_v47  ;;  %v1506_v62 = vmul.f32 %v6507_v52, %v1374_v50  ;;  %v1518_v7 = vmul.f32 %v6507_v52, %v1386_v54  ;;  %v5568_v51 = vld [vmem:[%s6377_s14 + $0x38] ss:$12 sps:$4 sm:$0xff]  }
 0x1cc   : > { %v6519_v5 = vpack.c.bf16 %v1492_v57, %v1480_v56  ;;  %v1516_v8 = vmul.f32 %v6502_v45, %v1384_v55  ;;  %v6531_v12 = vpack.c.bf16 %v1493_v59, %v1481_v53  ;;  %v6554_v41 = vpack.c.bf16 %v1515_v16, %v1503_v15  ;;  %v1395_v53 = vld [vmem:[#allocation5 + $0x180] sm:$0xff]  ;;  %v5576_v16 = vld [vmem:[%s6377_s14 + $0x364] ss:$12 sps:$4 sm:$0xff]  }
 0x1cd   : > { %v6525_v9 = vpack.c.bf16 %v1494_v61, %v1482_v60  ;;  %v6528_v11 = vpop.f32.mrb[4].mxu0  ;;  %v6539_v19 = vpack.c.bf16 %v1518_v7, %v1506_v62  ;;  %v1505_v42 = vmul.f32 %v6499_v40, %v1373_v17  ;;  %v1517_v43 = vmul.f32 %v6499_v40, %v1385_v21  ;;  %v1407_v54 = vld [vmem:[#allocation5 + $0x1e0] sm:$0xff]  ;;  %v1397_v7 = vld [vmem:[#allocation5 + $0x190] sm:$0xff] }
 0x1ce   : > { %3556 = vmatprep.mubr.bf16.mxu1 %v6519_v5  ;;  %v1147_v18 = vpop.f32.mrb[5].mxu0  ;;  %v6541_v20 = vpack.c.bf16 %v1516_v8, %v1504_v2  ;;  %v1530_v47 = vmul.f32 %v6507_v52, %v1398_v22  ;;  %v1542_v48 = vmul.f32 %v6507_v52, %v1410_v23  ;;  %v1528_v49 = vmul.f32 %v6502_v45, %v1396_v28  ;;  %v5564_v56 = vld [vmem:[%s6377_s14 + $0x330] ss:$12 sps:$4 sm:$0xff]   ;;  %v5571_v57 = vld [vmem:[%s6377_s14 + $0x34c] ss:$12 sps:$4 sm:$0xff]  }
 0x1cf   : > { %3627 = vmatprep.mubr.bf16.mxu0 %v6525_v9  ;;  %3557 = vmatmul.mubr.bf16.vlgmr.msra.gmra.mrb[12].mxu1 %v6512_v58  ;;  %v1149_v25 = vpop.f32.mrb[6].mxu0  ;;  %v6543_v26 = vpop.f32.mrb[4].mxu1  ;;  %v1540_v50 = vmul.f32 %v6502_v45, %v1408_v29  ;;  %v1148_v55 = vadd.f32 %v1147_v18, %v988_v31  ;;  %v6566_v59 = vpack.c.bf16 %v1517_v43, %v1505_v42  ;;  %v5572_v60 = vld [vmem:[%s6377_s14 + $0x110] ss:$12 sps:$4 sm:$0xff]   ;;  %v983_v61 = vsub.s32 4, %v6383_v24  ;;  %v1409_v8 = vld [vmem:[#allocation5 + $0x1f0] sm:$0xff] }
 0x1d0   : > { %3628 = vmatmul.mubr.bf16.vlgmr.msra.gmra.mrb[12].mxu0 %v6531_v12  ;;  %4919 = vmatpush3.bf16.msra.mxu1 %v5558_v6  ;;  %v1150_v32 = vpop.f32.mrb[7].mxu0  ;;  %v6548_v33 = vpop.f32.mrb[5].mxu1  ;;  %v6571_v2 = vpack.c.bf16 %v1542_v48, %v1530_v47  ;;  %v1527_v4 = vmul.f32 %v6496_v35, %v1395_v53  ;;  %v1539_v6 = vmul.f32 %v6496_v35, %v1407_v54  ;;  %v5577_v15 = vld [vmem:[%s6377_s14 + $0x128] ss:$12 sps:$4 sm:$0xff]   ;;  %v5574_v29 = vld [vmem:[%s6377_s14 + $0x360] ss:$12 sps:$4 sm:$0xff]  }
 0x1d1   : > { %3667 = vmatpush1.bf16.msra.mxu0 %v5554_v10  ;;  %3637 = vmatprep.mubr.bf16.mxu0 %v6539_v19  ;;  %v1190_v38 = vpop.f32.mrb[6].mxu1  ;;  %v4612_v62 = vmul.f32 -1.442695, %v1148_v55  ;;  %v6573_v3 = vpack.c.bf16 %v1540_v50, %v1528_v49  ;;  %v1422_v10 = vld [vmem:[#allocation5 + $0x258] sm:$0x1]  ;;  %v1529_v17 = vmul.f32 %v6499_v40, %v1397_v7  ;;  %v1541_v18 = vmul.f32 %v6499_v40, %v1409_v8 }
 0x1d2   : > { %3668 = vmatprep.subr.bf16.mxu0 %v5561_v13  ;;  %4920 = vmatprep.subr.bf16.mxu1 %v5562_v14  ;;  %v1191_v44 = vpop.f32.mrb[7].mxu1  ;;  %v1420_v13 = vld [vmem:[#allocation5 + $0x248] sm:$0x1]  ;;  %v5569_v14 = vld [vmem:[%s6377_s14 + $0x348] ss:$12 sps:$4 sm:$0xff]   ;;  %v984_v21 = vrot.slane %v6481_v63, %v983_v61  ;;  %v6587_v22 = vpack.c.bf16 %v1539_v6, %v1527_v4  ;;  %v1554_v23 = vmul.f32 %v6507_v52, %v1422_v10 }
 0x1d3   : > { %3566 = vmatprep.mubr.bf16.mxu1 %v6541_v20  ;;  %5853 = vpow2.f32 %v4612_v62  ;;  %v1552_v25 = vmul.f32 %v6502_v45, %v1420_v13  ;;  %v1419_v28 = vld [vmem:[#allocation5 + $0x240] sm:$0x1]  ;;  %v6593_v31 = vpack.c.bf16 %v1541_v18, %v1529_v17  ;;  %v5581_v32 = vld [vmem:[%s6377_s14 + $0x37c] ss:$12 sps:$4 sm:$0xff]   ;;  %v5583_v42 = vld [vmem:[%s6377_s14 + $0x80] ss:$12 sps:$4 sm:$0xff]  }
 0x1d4   : > { %4921 = vmatpush3.bf16.msra.mxu1 %v5563_v27  ;;  %v5578_v27 = vld [vmem:[%s6377_s14 + $0x68] ss:$12 sps:$4 sm:$0xff]   ;;  %v6599_v45 = vpack.c.bf16 %v1554_v23, %v1554_v23  ;;  %v1551_v38 = vmul.f32 %v6496_v35, %v1419_v28  ;;  %v5587_v43 = vld [vmem:[%s6377_s14 + $0x158] ss:$12 sps:$4 sm:$0xff]   ;;  %v5584_v53 = vld [vmem:[%s6377_s14 + $0x390] ss:$12 sps:$4 sm:$0xff]  }
 0x1d5   : > { %3669 = vmatpush1.bf16.msra.mxu0 %v5559_v34  ;;  %4922 = vmatprep.subr.bf16.mxu1 %v5567_v37  ;;  %v5582_v34 = vld [vmem:[%s6377_s14 + $0x140] ss:$12 sps:$4 sm:$0xff]   ;;  %v1146_v37 = vadd.f32 %v6528_v11, %v984_v21  ;;  %v6601_v52 = vpack.c.bf16 %v1552_v25, %v1552_v25  ;;  %v5579_v11 = vld [vmem:[%s6377_s14 + $0x378] ss:$12 sps:$4 sm:$0xff]   ;;  %v5592_v54 = vld [vmem:[%s6377_s14 + $0x170] ss:$12 sps:$4 sm:$0xff]  }
 0x1d6   : > { %3670 = vmatprep.subr.bf16.mxu0 %v5566_v39  ;;  %v1421_v39 = vld [vmem:[#allocation5 + $0x250] sm:$0x1]  ;;  %v5586_v47 = vld [vmem:[%s6377_s14 + $0x394] ss:$12 sps:$4 sm:$0xff]   ;;  %v6612_v49 = vpack.c.bf16 %v1551_v38, %v1551_v38  ;;  %v5591_v55 = vld [vmem:[%s6377_s14 + $0x3ac] ss:$12 sps:$4 sm:$0xff]  }
 0x1d7   : > { %3567 = vmatmul.mubr.bf16.gmra.mrb[16].mxu1 %v6554_v41  ;;  %v4611_v48 = vmul.f32 -1.442695, %v1146_v37  ;;  %v1553_v35 = vmul.f32 %v6499_v40, %v1421_v39  ;;  %v5596_v61 = vld [vmem:[%s6377_s14 + $0x3c4] ss:$12 sps:$4 sm:$0xff]   ;;  %v5598_v62 = vld [vmem:[%s6377_s14 + $0x188] ss:$12 sps:$4 sm:$0xff]  }
 0x1d8   : > { %3638 = vmatmul.mubr.bf16.gmra.mrb[16].mxu0 %v6566_v59  ;;  %4923 = vmatpush3.bf16.msra.mxu1 %v5568_v51  ;;  %v5588_v51 = vld [vmem:[%s6377_s14 + $0x98] ss:$12 sps:$4 sm:$0xff]   ;;  %v5594_v4 = vld [vmem:[%s6377_s14 + $0x3c0] ss:$12 sps:$4 sm:$0xff]   ;;  %v5601_v7 = vld [vmem:[%s6377_s14 + $0x3dc] ss:$12 sps:$4 sm:$0xff]  }
 0x1d9   : > { %3671 = vmatpush1.bf16.msra.mxu0 %v5564_v56  ;;  %3647 = vmatprep.mubr.bf16.mxu0 %v6571_v2  ;;  %v6617_v40 = vpack.c.bf16 %v1553_v35, %v1553_v35  ;;  %v5593_v56 = vld [vmem:[%s6377_s14 + $0xb0] ss:$12 sps:$4 sm:$0xff]   ;;  %v5602_v6 = vld [vmem:[%s6377_s14 + $0x260] ss:$12 sps:$4 sm:$0xff]   ;;  %v995_v17 = vsub.s32 7, %v6383_v24 }
 0x1da   : > { %3672 = vmatprep.subr.bf16.mxu0 %v5571_v57  ;;  %4924 = vmatprep.subr.bf16.mxu1 %v5572_v60  ;;  %v5589_v57 = vld [vmem:[%s6377_s14 + $0x3a8] ss:$12 sps:$4 sm:$0xff]   ;;  %v1364_v10 = vld [vmem:[#allocation5 + $0x88] sm:$0xff]  ;;  %v5611_v39 = vld [vmem:[%s6377_s14 + $0x40c] ss:$12 sps:$4 sm:$0xff]  }
 0x1db   : > { %3576 = vmatprep.mubr.bf16.mxu1 %v6573_v3  ;;  %v5597_v60 = vld [vmem:[%s6377_s14 + $0x248] ss:$12 sps:$4 sm:$0xff]   ;;  %v5608_v28 = vld [vmem:[%s6377_s14 + $0x1b8] ss:$12 sps:$4 sm:$0xff]   ;;  %v5612_v37 = vld [vmem:[%s6377_s14 + $0x290] ss:$12 sps:$4 sm:$0xff]   ;;  %v996_v38 = vrot.slane %v6481_v63, %v995_v17 }
 0x1dc   : > { %4925 = vmatpush3.bf16.msra.mxu1 %v5573_v46  ;;  %v1352_v46 = vld [vmem:[#allocation5 + $0x28] sm:$0xff] }
 0x1dd   : > { %3673 = vmatpush1.bf16.msra.mxu0 %v5569_v14  ;;  %4926 = vmatprep.subr.bf16.mxu1 %v5577_v15  ;;  %v5854_v44 = vpop.eup %5853  ;;  %v5603_v14 = vld [vmem:[%s6377_s14 + $0x1a0] ss:$12 sps:$4 sm:$0xff]   ;;  %v5599_v15 = vld [vmem:[%s6377_s14 + $0x3d8] ss:$12 sps:$4 sm:$0xff]  }
 0x1de   : > { %3674 = vmatprep.subr.bf16.mxu0 %v5576_v16  ;;  %v1316_v50 = vadd.f32 1.0, %v5854_v44  ;;  %v5607_v16 = vld [vmem:[%s6377_s14 + $0x278] ss:$12 sps:$4 sm:$0xff]   ;;  %v5606_v18 = vld [vmem:[%s6377_s14 + $0x3f4] ss:$12 sps:$4 sm:$0xff]   ;;  %v1189_v44 = vadd.f32 %v6548_v33, %v996_v38 }
 0x1df   : > { %3577 = vmatmul.mubr.bf16.gmra.mrb[20].mxu1 %v6587_v22  ;;  %v5622_v35 = vld [vmem:[%s6377_s14 + $0x2c0] ss:$12 sps:$4 sm:$0xff]  }
 0x1e0   : > { %3648 = vmatmul.mubr.bf16.gmra.mrb[20].mxu0 %v6593_v31  ;;  %4927 = vmatpush3.bf16.msra.mxu1 %v5578_v27  ;;  %5855 = vrcp.f32 %v1316_v50  ;;  %v5621_v50 = vld [vmem:[%s6377_s14 + $0x43c] ss:$12 sps:$4 sm:$0xff]   ;;  %v5623_v33 = vld [vmem:[%s6377_s14 + $0x200] ss:$12 sps:$4 sm:$0xff]  }
 0x1e1   : > { %3675 = vmatpush1.bf16.msra.mxu0 %v5574_v29  ;;  %3657 = vmatprep.mubr.bf16.mxu0 %v6599_v45  ;;  %5857 = vpow2.f32 %v4611_v48  ;;  %v5618_v48 = vld [vmem:[%s6377_s14 + $0x1e8] ss:$12 sps:$4 sm:$0xff]   ;;  %v1388_v17 = vld [vmem:[#allocation5 + $0x148] sm:$0xff] }
 0x1e2   : > { %3676 = vmatprep.subr.bf16.mxu0 %v5581_v32  ;;  %4928 = vmatprep.subr.bf16.mxu1 %v5582_v34  ;;  %v5604_v34 = vld [vmem:[%s6377_s14 + $0x3f0] ss:$12 sps:$4 sm:$0xff]  }
 0x1e3   : > { %3586 = vmatprep.mubr.bf16.mxu1 %v6601_v52 }
 0x1e4   : > { %4929 = vmatpush3.bf16.msra.mxu1 %v5583_v42  ;;  %v5613_v42 = vld [vmem:[%s6377_s14 + $0x1d0] ss:$12 sps:$4 sm:$0xff]  }
 0x1e5   : > { %3677 = vmatpush1.bf16.msra.mxu0 %v5579_v11  ;;  %4930 = vmatprep.subr.bf16.mxu1 %v5587_v43  ;;  %v5609_v11 = vld [vmem:[%s6377_s14 + $0x408] ss:$12 sps:$4 sm:$0xff]  }
 0x1e6   : > { %3678 = vmatprep.subr.bf16.mxu0 %v5586_v47  ;;  %v5617_v43 = vld [vmem:[%s6377_s14 + $0x2a8] ss:$12 sps:$4 sm:$0xff]   ;;  %v5616_v47 = vld [vmem:[%s6377_s14 + $0x424] ss:$12 sps:$4 sm:$0xff]  }
 0x1e7   : > { %3587 = vmatmul.mubr.bf16.gmra.mrb[24].mxu1 %v6612_v49 }
 0x1e8   : > { %3658 = vmatmul.mubr.bf16.gmra.mrb[24].mxu0 %v6617_v40  ;;  %4931 = vmatpush3.bf16.msra.mxu1 %v5588_v51  ;;  %v6669_v51 = vld [vmem:[#allocation8 + $0x8] sm:$0xf] }
 0x1e9   : > { %3679 = vmatpush1.bf16.msra.mxu0 %v5584_v53  ;;  %4932 = vmatprep.subr.bf16.mxu1 %v5592_v54  ;;  %v5619_v54 = vld [vmem:[%s6377_s14 + $0x438] ss:$12 sps:$4 sm:$0xff]  }
 0x1ea   : > { %3680 = vmatprep.subr.bf16.mxu0 %v5591_v55  ;;  %3982 = vmatprep.mubr.bf16.mxu1 %v6519_v5  ;;  %v5856_v8 = vpop.eup %5855  ;;  %v5627_v55 = vld [vmem:[%s6377_s14 + $0x2d8] ss:$12 sps:$4 sm:$0xff]  }
 0x1eb   : > { %v5858_v13 = vpop.eup %5857  ;;  %v6633_v5 = vrot.slane %v5856_v8, %v6389_v36  ;;  %v1351_v8 = vld [vmem:[#allocation5 + $0x20] sm:$0xff] }
 0x1ec   : > { %4933 = vmatpush3.bf16.msra.mxu1 %v5593_v56  ;;  %v1315_v25 = vadd.f32 1.0, %v5858_v13  ;;  %v1008_v56 = vrot.slane %v6669_v51, %v975_v0  ;;  %v5632_v0 = vld [vmem:[%s6377_s14 + $0x2f0] ss:$12 sps:$4 sm:$0xff]  }
 0x1ed   : > { %3681 = vmatpush1.bf16.msra.mxu0 %v5589_v57  ;;  %4958 = vmatprep.subr.bf16.mxu1 %v5597_v60  ;;  %v1484_v21 = vmul.f32 %v6633_v5, %v1352_v46  ;;  %v1496_v23 = vmul.f32 %v6633_v5, %v1364_v10  ;;  %v1363_v46 = vld [vmem:[#allocation5 + $0x80] sm:$0xff] }
 0x1ee   : > { %3682 = vmatprep.subr.bf16.mxu0 %v5596_v61  ;;  %5859 = vrcp.f32 %v1315_v25  ;;  %v5631_v10 = vld [vmem:[%s6377_s14 + $0x46c] ss:$12 sps:$4 sm:$0xff]   ;;  %v5633_v13 = vld [vmem:[%s6377_s14 + $0x230] ss:$12 sps:$4 sm:$0xff]   ;;  %v1520_v25 = vmul.f32 %v6633_v5, %v1388_v17 }
 0x1ef   : > { %3983 = vmatmul.mubr.bf16.vlgmr.msra.gmra.mrb[28].mxu1 %v6512_v58  ;;  %v6648_v29 = vpack.c.bf16 %v1496_v23, %v1484_v21  ;;  %v5637_v21 = vld [vmem:[%s6377_s14 + $0x3c8] ss:$12 sps:$4 sm:$0xff]   ;;  %v5654_v17 = vld [vmem:[%s6377_s14 + $0x4e0] ss:$12 sps:$4 sm:$0xff]  }
 0x1f0   : > { %4959 = vmatpush3.bf16.msra.mxu1 %v5598_v62  ;;  %3990 = vmatprep.mubr.bf16.mxu1 %v6541_v20 }
 0x1f1   : > { %3683 = vmatpush1.bf16.msra.mxu0 %v5594_v4  ;;  %4960 = vmatprep.subr.bf16.mxu1 %v5602_v6  ;;  %v6640_v58 = vpop.f32.mrb[8].mxu0  ;;  %v5624_v4 = vld [vmem:[%s6377_s14 + $0x450] ss:$12 sps:$4 sm:$0xff]   ;;  %v5628_v6 = vld [vmem:[%s6377_s14 + $0x218] ss:$12 sps:$4 sm:$0xff]  }
 0x1f2   : > { %3684 = vmatprep.subr.bf16.mxu0 %v5601_v7  ;;  %v6645_v20 = vpop.f32.mrb[9].mxu0  ;;  %3698 = vmatprep.mubr.bf16.mxu0 %v6648_v29 }
 0x1f3   : > { %v1231_v27 = vpop.f32.mrb[10].mxu0 }
 0x1f4   : > { %4961 = vmatpush3.bf16.msra.mxu1 %v5603_v14  ;;  %v1232_v32 = vpop.f32.mrb[11].mxu0 }
 0x1f5   : > { %3685 = vmatpush1.bf16.msra.mxu0 %v5599_v15  ;;  %4962 = vmatprep.subr.bf16.mxu1 %v5607_v16  ;;  %v1376_v16 = vld [vmem:[#allocation5 + $0xe8] sm:$0xff] }
 0x1f6   : > { %3686 = vmatprep.subr.bf16.mxu0 %v5606_v18  ;;  %v5629_v18 = vld [vmem:[%s6377_s14 + $0x468] ss:$12 sps:$4 sm:$0xff]   ;;  %v5634_v32 = vld [vmem:[%s6377_s14 + $0x480] ss:$12 sps:$4 sm:$0xff]  }
 0x1f7   : > { %3991 = vmatmul.mubr.bf16.gmra.mrb[32].mxu1 %v6554_v41  ;;  %v5614_v41 = vld [vmem:[%s6377_s14 + $0x420] ss:$12 sps:$4 sm:$0xff]  }
 0x1f8   : > { %4963 = vmatpush3.bf16.msra.mxu1 %v5608_v28  ;;  %3998 = vmatprep.mubr.bf16.mxu1 %v6573_v3  ;;  %v4614_v3 = vmul.f32 -1.442695, %v1189_v44  ;;  %v5860_v53 = vpop.eup %5859  ;;  %v5638_v28 = vld [vmem:[%s6377_s14 + $0x308] ss:$12 sps:$4 sm:$0xff]   ;;  %v1400_v44 = vld [vmem:[#allocation5 + $0x1a8] sm:$0xff] }
 0x1f9   : > { %3687 = vmatpush1.bf16.msra.mxu0 %v5604_v34  ;;  %4964 = vmatprep.subr.bf16.mxu1 %v5612_v37  ;;  %v6682_v62 = vrot.slane %v5860_v53, %v6389_v36  ;;  %v5641_v34 = vld [vmem:[%s6377_s14 + $0x49c] ss:$12 sps:$4 sm:$0xff]   ;;  %v5648_v53 = vld [vmem:[%s6377_s14 + $0x338] ss:$12 sps:$4 sm:$0xff]  }
 0x1fa   : > { %3688 = vmatprep.subr.bf16.mxu0 %v5611_v39  ;;  %5861 = vpow2.f32 %v4614_v3  ;;  %v5642_v39 = vld [vmem:[%s6377_s14 + $0x3e0] ss:$12 sps:$4 sm:$0xff]  }
 0x1fb   : > { %v1483_v14 = vmul.f32 %v6682_v62, %v1351_v8  ;;  %v1495_v15 = vmul.f32 %v6682_v62, %v1363_v46  ;;  %v5646_v3 = vld [vmem:[%s6377_s14 + $0x4b4] ss:$12 sps:$4 sm:$0xff]  }
 0x1fc   : > { %4965 = vmatpush3.bf16.msra.mxu1 %v5613_v42  ;;  %v1375_v42 = vld [vmem:[#allocation5 + $0xe0] sm:$0xff] }
 0x1fd   : > { %3689 = vmatpush1.bf16.msra.mxu0 %v5609_v11  ;;  %4966 = vmatprep.subr.bf16.mxu1 %v5617_v43  ;;  %v6698_v27 = vpack.c.bf16 %v1495_v15, %v1483_v14  ;;  %v1387_v11 = vld [vmem:[#allocation5 + $0x140] sm:$0xff]  ;;  %v5643_v43 = vld [vmem:[%s6377_s14 + $0x320] ss:$12 sps:$4 sm:$0xff]  }
 0x1fe   : > { %3690 = vmatprep.subr.bf16.mxu0 %v5616_v47  ;;  %v1412_v47 = vld [vmem:[#allocation5 + $0x208] sm:$0xff]  ;;  %v5657_v8 = vld [vmem:[%s6377_s14 + $0x428] ss:$12 sps:$4 sm:$0xff]  }
 0x1ff   : > { %3999 = vmatmul.mubr.bf16.gmra.mrb[36].mxu1 %v6587_v22  ;;  %v1268_v22 = vpop.f32.mrb[8].mxu1 }
 0x200   : > { %4967 = vmatpush3.bf16.msra.mxu1 %v5618_v48  ;;  %4006 = vmatprep.mubr.bf16.mxu1 %v6601_v52  ;;  %v5626_v52 = vld [vmem:[%s6377_s14 + $0x454] ss:$12 sps:$4 sm:$0xff]   ;;  %v6677_v57 = vpop.f32.mrb[9].mxu1  ;;  %v6679_v60 = vadd.f32 %v1268_v22, %v1008_v56  ;;  %v5639_v48 = vld [vmem:[%s6377_s14 + $0x498] ss:$12 sps:$4 sm:$0xff]   ;;  %v991_v56 = vsub.s32 6, %v6383_v24 }
 0x201   : > { %3691 = vmatpush1.bf16.msra.mxu0 %v5614_v41  ;;  %4968 = vmatprep.subr.bf16.mxu1 %v5622_v35  ;;  %v1272_v61 = vpop.f32.mrb[10].mxu1  ;;  %v5647_v41 = vld [vmem:[%s6377_s14 + $0x3f8] ss:$12 sps:$4 sm:$0xff]   ;;  %v1519_v35 = vmul.f32 %v6682_v62, %v1387_v11 }
 0x202   : > { %3692 = vmatprep.subr.bf16.mxu0 %v5621_v50  ;;  %v1273_v7 = vpop.f32.mrb[11].mxu1  ;;  %v1532_v50 = vmul.f32 %v6633_v5, %v1400_v44  ;;  %v1399_v61 = vld [vmem:[#allocation5 + $0x1a0] sm:$0xff]  ;;  %v1401_v24 = vld [vmem:[#allocation5 + $0x1b0] sm:$0xff] }
 0x203   : > { %v1424_v7 = vld [vmem:[#allocation5 + $0x268] sm:$0x1]  ;;  %v5668_v11 = vld [vmem:[%s6377_s14 + $0x398] ss:$12 sps:$4 sm:$0xff]  }
 0x204   : > { %4969 = vmatpush3.bf16.msra.mxu1 %v5623_v33  ;;  %v5862_v23 = vpop.eup %5861  ;;  %v1544_v33 = vmul.f32 %v6633_v5, %v1412_v47  ;;  %v1556_v14 = vmul.f32 %v6633_v5, %v1424_v7  ;;  %v5672_v44 = vld [vmem:[%s6377_s14 + $0x470] ss:$12 sps:$4 sm:$0xff]  }
 0x205   : > { %3693 = vmatpush1.bf16.msra.mxu0 %v5619_v54  ;;  %4970 = vmatprep.subr.bf16.mxu1 %v5627_v55  ;;  %v1318_v37 = vadd.f32 1.0, %v5862_v23  ;;  %v5644_v54 = vld [vmem:[%s6377_s14 + $0x4b0] ss:$12 sps:$4 sm:$0xff]   ;;  %v5651_v55 = vld [vmem:[%s6377_s14 + $0x4cc] ss:$12 sps:$4 sm:$0xff]  }
 0x206   : > { %3694 = vmatprep.subr.bf16.mxu0 %v5626_v52  ;;  %v6724_v22 = vpack.c.bf16 %v1544_v33, %v1532_v50  ;;  %v5652_v52 = vld [vmem:[%s6377_s14 + $0x410] ss:$12 sps:$4 sm:$0xff]   ;;  %v5682_v50 = vld [vmem:[%s6377_s14 + $0x560] ss:$12 sps:$4 sm:$0xff]  }
 0x207   : > { %4007 = vmatmul.mubr.bf16.gmra.mrb[40].mxu1 %v6612_v49  ;;  %v5636_v49 = vld [vmem:[%s6377_s14 + $0x484] ss:$12 sps:$4 sm:$0xff]   ;;  %5863 = vrcp.f32 %v1318_v37 }
 0x208   : > { %4971 = vmatpush3.bf16.msra.mxu1 %v5628_v6  ;;  %4046 = vmatprep.mubr.bf16.mxu1 %v6525_v9  ;;  %v1508_v9 = vmul.f32 %v6633_v5, %v1376_v16  ;;  %v5653_v6 = vld [vmem:[%s6377_s14 + $0x350] ss:$12 sps:$4 sm:$0xff]   ;;  %v5658_v16 = vld [vmem:[%s6377_s14 + $0x368] ss:$12 sps:$4 sm:$0xff]  }
 0x209   : > { %3695 = vmatpush1.bf16.msra.mxu0 %v5624_v4  ;;  %4972 = vmatprep.subr.bf16.mxu1 %v5632_v0  ;;  %v1411_v4 = vld [vmem:[#allocation5 + $0x200] sm:$0xff] }
 0x20a   : > { %3696 = vmatprep.subr.bf16.mxu0 %v5631_v10  ;;  %v6703_v38 = vpack.c.bf16 %v1520_v25, %v1508_v9  ;;  %v5649_v0 = vld [vmem:[%s6377_s14 + $0x4c8] ss:$12 sps:$4 sm:$0xff]   ;;  %v1543_v46 = vmul.f32 %v6682_v62, %v1411_v4  ;;  %v5656_v10 = vld [vmem:[%s6377_s14 + $0x4e4] ss:$12 sps:$4 sm:$0xff]   ;;  %v5663_v9 = vld [vmem:[%s6377_s14 + $0x380] ss:$12 sps:$4 sm:$0xff]  }
 0x20b   : > { %v1423_v5 = vld [vmem:[#allocation5 + $0x260] sm:$0x1]  ;;  %v1354_v25 = vld [vmem:[#allocation5 + $0x38] sm:$0xff] }
 0x20c   : > { %4973 = vmatpush3.bf16.msra.mxu1 %v5633_v13  ;;  %v992_v13 = vrot.slane %v6481_v63, %v991_v56  ;;  %v5662_v63 = vld [vmem:[%s6377_s14 + $0x440] ss:$12 sps:$4 sm:$0xff]   ;;  %v5684_v4 = vld [vmem:[%s6377_s14 + $0x570] ss:$12 sps:$4 sm:$0xff]  }
 0x20d   : > { %3697 = vmatpush1.bf16.msra.mxu0 %v5629_v18  ;;  %4998 = vmatprep.subr.bf16.mxu1 %v5637_v21  ;;  %v5661_v18 = vld [vmem:[%s6377_s14 + $0x4fc] ss:$12 sps:$4 sm:$0xff]   ;;  %v5686_v56 = vld [vmem:[%s6377_s14 + $0x574] ss:$12 sps:$4 sm:$0xff]  }
 0x20e   : > { %3737 = vmatprep.subr.bf16.mxu0 %v5636_v49  ;;  %v1187_v21 = vadd.f32 %v6543_v26, %v992_v13  ;;  %v6745_v49 = vpack.c.bf16 %v1556_v14, %v1556_v14  ;;  %v5659_v26 = vld [vmem:[%s6377_s14 + $0x4f8] ss:$12 sps:$4 sm:$0xff]   ;;  %v5693_v7 = vld [vmem:[%s6377_s14 + $0x4d0] ss:$12 sps:$4 sm:$0xff]  }
 0x20f   : > { %4047 = vmatmul.mubr.bf16.vlgmr.msra.gmra.mrb[44].mxu1 %v6531_v12  ;;  %v1507_v12 = vmul.f32 %v6682_v62, %v1375_v42  ;;  %v5701_v14 = vld [vmem:[%s6377_s14 + $0x5bc] ss:$12 sps:$4 sm:$0xff]  }
 0x210   : > { %3699 = vmatmul.mubr.bf16.vlgmr.msra.gmra.mrb[12].mxu0 %v6698_v27  ;;  %4999 = vmatpush3.bf16.msra.mxu1 %v5638_v28  ;;  %v1366_v28 = vld [vmem:[#allocation5 + $0x98] sm:$0xff]  ;;  %v4613_v37 = vmul.f32 -1.442695, %v1187_v21 }
 0x211   : > { %3708 = vmatprep.mubr.bf16.mxu0 %v6703_v38  ;;  %3738 = vmatpush1.bf16.msra.mxu0 %v5634_v32  ;;  %v5864_v15 = vpop.eup %5863  ;;  %v5667_v32 = vld [vmem:[%s6377_s14 + $0x458] ss:$12 sps:$4 sm:$0xff]  }
 0x212   : > { %4054 = vmatprep.mubr.bf16.mxu1 %v6539_v19  ;;  %3739 = vmatprep.subr.bf16.mxu0 %v5641_v34  ;;  %v6720_v19 = vpack.c.bf16 %v1519_v35, %v1507_v12  ;;  %v6750_v23 = vrot.slane %v5864_v15, %v6389_v36  ;;  %v5666_v34 = vld [vmem:[%s6377_s14 + $0x514] ss:$12 sps:$4 sm:$0xff]   ;;  %5865 = vpow2.f32 %v4613_v37  ;;  %v5676_v35 = vld [vmem:[%s6377_s14 + $0x544] ss:$12 sps:$4 sm:$0xff]  }
 0x213   : > { %5000 = vmatprep.subr.bf16.mxu1 %v5642_v39  ;;  %v5677_v12 = vld [vmem:[%s6377_s14 + $0x548] ss:$12 sps:$4 sm:$0xff]   ;;  %v5703_v15 = vld [vmem:[%s6377_s14 + $0x500] ss:$12 sps:$4 sm:$0xff]  }
 0x214   : > { %5001 = vmatpush3.bf16.msra.mxu1 %v5643_v43  ;;  %v1486_v39 = vmul.f32 %v6750_v23, %v1354_v25  ;;  %v1498_v42 = vmul.f32 %v6750_v23, %v1366_v28  ;;  %v5664_v43 = vld [vmem:[%s6377_s14 + $0x510] ss:$12 sps:$4 sm:$0xff]   ;;  %v1365_v25 = vld [vmem:[#allocation5 + $0x90] sm:$0xff] }
 0x215   : > { %3740 = vmatpush1.bf16.msra.mxu0 %v5639_v48  ;;  %5002 = vmatprep.subr.bf16.mxu1 %v5647_v41  ;;  %v5673_v48 = vld [vmem:[%s6377_s14 + $0x3b0] ss:$12 sps:$4 sm:$0xff]   ;;  %v5669_v41 = vld [vmem:[%s6377_s14 + $0x528] ss:$12 sps:$4 sm:$0xff]   ;;  %v5711_v28 = vld [vmem:[%s6377_s14 + $0x5ec] ss:$12 sps:$4 sm:$0xff]  }
 0x216   : > { %3741 = vmatprep.subr.bf16.mxu0 %v5646_v3  ;;  %v6769_v47 = vpack.c.bf16 %v1498_v42, %v1486_v39  ;;  %v5674_v3 = vld [vmem:[%s6377_s14 + $0x540] ss:$12 sps:$4 sm:$0xff]   ;;  %v5709_v39 = vld [vmem:[%s6377_s14 + $0x5e8] ss:$12 sps:$4 sm:$0xff]  }
 0x217   : > { %4055 = vmatmul.mubr.bf16.gmra.mrb[48].mxu1 %v6566_v59  ;;  %v1531_v59 = vmul.f32 %v6682_v62, %v1399_v61  ;;  %v5688_v61 = vld [vmem:[%s6377_s14 + $0x4b8] ss:$12 sps:$4 sm:$0xff]   ;;  %v1390_v37 = vld [vmem:[#allocation5 + $0x158] sm:$0xff] }
 0x218   : > { %3709 = vmatmul.mubr.bf16.gmra.mrb[16].mxu0 %v6720_v19  ;;  %5003 = vmatpush3.bf16.msra.mxu1 %v5648_v53  ;;  %v5683_v53 = vld [vmem:[%s6377_s14 + $0x4a0] ss:$12 sps:$4 sm:$0xff]   ;;  %v5717_v42 = vld [vmem:[%s6377_s14 + $0x6c8] ss:$12 sps:$4 sm:$0xff]  }
 0x219   : > { %3718 = vmatprep.mubr.bf16.mxu0 %v6724_v22  ;;  %3742 = vmatpush1.bf16.msra.mxu0 %v5644_v54  ;;  %v5679_v54 = vld [vmem:[%s6377_s14 + $0x558] ss:$12 sps:$4 sm:$0xff]  }
 0x21a   : > { %4062 = vmatprep.mubr.bf16.mxu1 %v6571_v2  ;;  %3743 = vmatprep.subr.bf16.mxu0 %v5651_v55  ;;  %v6741_v2 = vpack.c.bf16 %v1543_v46, %v1531_v59  ;;  %v5687_v55 = vld [vmem:[%s6377_s14 + $0x578] ss:$12 sps:$4 sm:$0xff]   ;;  %v1000_v59 = vrot.slane %v6669_v51, %v6389_v36 }
 0x21b   : > { %5004 = vmatprep.subr.bf16.mxu1 %v5652_v52  ;;  %v5696_v46 = vld [vmem:[%s6377_s14 + $0x5a4] ss:$12 sps:$4 sm:$0xff]  }
 0x21c   : > { %5005 = vmatpush3.bf16.msra.mxu1 %v5653_v6  ;;  %v5866_v33 = vpop.eup %5865  ;;  %v5691_v6 = vld [vmem:[%s6377_s14 + $0x58c] ss:$12 sps:$4 sm:$0xff]   ;;  %v1228_v13 = vadd.f32 %v6640_v58, %v1000_v59  ;;  %v5706_v58 = vld [vmem:[%s6377_s14 + $0x5d4] ss:$12 sps:$4 sm:$0xff]  }
 0x21d   : > { %3744 = vmatpush1.bf16.msra.mxu0 %v5649_v0  ;;  %5006 = vmatprep.subr.bf16.mxu1 %v5657_v8  ;;  %v1317_v52 = vadd.f32 1.0, %v5866_v33  ;;  %v5689_v0 = vld [vmem:[%s6377_s14 + $0x588] ss:$12 sps:$4 sm:$0xff]   ;;  %v5723_v33 = vld [vmem:[%s6377_s14 + $0x620] ss:$12 sps:$4 sm:$0xff]  }
 0x21e   : > { %3745 = vmatprep.subr.bf16.mxu0 %v5656_v10  ;;  %v5697_v8 = vld [vmem:[%s6377_s14 + $0x5a8] ss:$12 sps:$4 sm:$0xff]   ;;  %v4615_v21 = vmul.f32 -1.442695, %v1228_v13  ;;  %v5731_v59 = vld [vmem:[%s6377_s14 + $0x64c] ss:$12 sps:$4 sm:$0xff]  }
 0x21f   : > { %4063 = vmatmul.mubr.bf16.gmra.mrb[52].mxu1 %v6593_v31  ;;  %v1555_v31 = vmul.f32 %v6682_v62, %v1423_v5  ;;  %v5671_v62 = vld [vmem:[%s6377_s14 + $0x52c] ss:$12 sps:$4 sm:$0xff]   ;;  %5867 = vrcp.f32 %v1317_v52 }
 0x220   : > { %3719 = vmatmul.mubr.bf16.gmra.mrb[20].mxu0 %v6741_v2  ;;  %5007 = vmatpush3.bf16.msra.mxu1 %v5658_v16  ;;  %v5708_v5 = vld [vmem:[%s6377_s14 + $0x518] ss:$12 sps:$4 sm:$0xff]  }
 0x221   : > { %3728 = vmatprep.mubr.bf16.mxu0 %v6745_v49  ;;  %3746 = vmatpush1.bf16.msra.mxu0 %v5654_v17  ;;  %v5699_v17 = vld [vmem:[%s6377_s14 + $0x5b8] ss:$12 sps:$4 sm:$0xff]  }
 0x222   : > { %4070 = vmatprep.mubr.bf16.mxu1 %v6599_v45  ;;  %3747 = vmatprep.subr.bf16.mxu0 %v5661_v18  ;;  %v6764_v45 = vpack.c.bf16 %v1555_v31, %v1555_v31  ;;  %v5707_v18 = vld [vmem:[%s6377_s14 + $0x5d8] ss:$12 sps:$4 sm:$0xff]  }
 0x223   : > { %5008 = vmatprep.subr.bf16.mxu1 %v5662_v63 }
 0x224   : > { %5009 = vmatpush3.bf16.msra.mxu1 %v5663_v9  ;;  %v1353_v9 = vld [vmem:[#allocation5 + $0x30] sm:$0xff] }
 0x225   : > { %3748 = vmatpush1.bf16.msra.mxu0 %v5659_v26  ;;  %5010 = vmatprep.subr.bf16.mxu1 %v5667_v32  ;;  %v5713_v26 = vld [vmem:[%s6377_s14 + $0x530] ss:$12 sps:$4 sm:$0xff]  }
 0x226   : > { %3749 = vmatprep.subr.bf16.mxu0 %v5666_v34  ;;  %v1378_v34 = vld [vmem:[#allocation5 + $0xf8] sm:$0xff] }
 0x227   : > { %4071 = vmatmul.mubr.bf16.gmra.mrb[56].mxu1 %v6617_v40  ;;  %v5678_v40 = vld [vmem:[%s6377_s14 + $0x488] ss:$12 sps:$4 sm:$0xff]  }
 0x228   : > { %3729 = vmatmul.mubr.bf16.gmra.mrb[24].mxu0 %v6764_v45  ;;  %5011 = vmatpush3.bf16.msra.mxu1 %v5668_v11 }
 0x229   : > { %3750 = vmatpush1.bf16.msra.mxu0 %v5664_v43  ;;  %4110 = vmatprep.mubr.bf16.mxu1 %v6648_v29  ;;  %v5681_v29 = vld [vmem:[%s6377_s14 + $0x55c] ss:$12 sps:$4 sm:$0xff]   ;;  %v5868_v16 = vpop.eup %5867  ;;  %v5716_v43 = vld [vmem:[%s6377_s14 + $0x604] ss:$12 sps:$4 sm:$0xff]  }
 0x22a   : > { %3751 = vmatprep.subr.bf16.mxu0 %v5671_v62  ;;  %5012 = vmatprep.subr.bf16.mxu1 %v5672_v44  ;;  %v6815_v63 = vrot.slane %v5868_v16, %v6389_v36  ;;  %v1522_v62 = vmul.f32 %v6750_v23, %v1390_v37 }
 0x22b   : > { %3769 = vmatprep.mubr.bf16.mxu0 %v6769_v47 }
 0x22c   : > { %5013 = vmatpush3.bf16.msra.mxu1 %v5673_v48  ;;  %v1485_v32 = vmul.f32 %v6815_v63, %v1353_v9  ;;  %v1497_v31 = vmul.f32 %v6815_v63, %v1365_v25  ;;  %v1533_v13 = vmul.f32 %v6815_v63, %v1401_v24  ;;  %v1425_v9 = vld [vmem:[#allocation5 + $0x270] sm:$0x1] }
 0x22d   : > { %3752 = vmatpush1.bf16.msra.mxu0 %v5669_v41  ;;  %5038 = vmatprep.subr.bf16.mxu1 %v5677_v12  ;;  %v5714_v41 = vld [vmem:[%s6377_s14 + $0x600] ss:$12 sps:$4 sm:$0xff]   ;;  %v5721_v12 = vld [vmem:[%s6377_s14 + $0x61c] ss:$12 sps:$4 sm:$0xff]   ;;  %v1557_v37 = vmul.f32 %v6815_v63, %v1425_v9 }
 0x22e   : > { %3753 = vmatprep.subr.bf16.mxu0 %v5676_v35  ;;  %v1569_v44 = vpack.c.bf16 %v1497_v31, %v1485_v32  ;;  %v1377_v35 = vld [vmem:[#allocation5 + $0xf0] sm:$0xff] }
 0x22f   : > { %4111 = vmatmul.mubr.bf16.vlgmr.msra.gmra.mrb[60].mxu1 %v6698_v27  ;;  %v1004_v27 = vrot.slane %v6669_v51, %v6386_v30  ;;  %v5743_v31 = vld [vmem:[%s6377_s14 + $0x680] ss:$12 sps:$4 sm:$0xff]   ;;  %v5760_v24 = vld [vmem:[%s6377_s14 + $0x6dc] ss:$12 sps:$4 sm:$0xff]  }
 0x230   : > { %5039 = vmatpush3.bf16.msra.mxu1 %v5678_v40  ;;  %4118 = vmatprep.mubr.bf16.mxu1 %v6703_v38  ;;  %v5692_v38 = vld [vmem:[%s6377_s14 + $0x590] ss:$12 sps:$4 sm:$0xff]   ;;  %v1389_v40 = vld [vmem:[#allocation5 + $0x150] sm:$0xff] }
 0x231   : > { %3754 = vmatpush1.bf16.msra.mxu0 %v5674_v3  ;;  %5040 = vmatprep.subr.bf16.mxu1 %v5682_v50  ;;  %v1230_v30 = vadd.f32 %v6645_v20, %v1004_v27  ;;  %v5702_v20 = vld [vmem:[%s6377_s14 + $0x5c0] ss:$12 sps:$4 sm:$0xff]   ;;  %v1521_v52 = vmul.f32 %v6815_v63, %v1389_v40 }
 0x232   : > { %3755 = vmatprep.subr.bf16.mxu0 %v5681_v29  ;;  %v5722_v29 = vld [vmem:[%s6377_s14 + $0x6e0] ss:$12 sps:$4 sm:$0xff]  }
 0x233   : > { %v4616_v10 = vmul.f32 -1.442695, %v1230_v30  ;;  %v5728_v30 = vld [vmem:[%s6377_s14 + $0x638] ss:$12 sps:$4 sm:$0xff]  }
 0x234   : > { %5041 = vmatpush3.bf16.msra.mxu1 %v5683_v53  ;;  %v1402_v53 = vld [vmem:[#allocation5 + $0x1b8] sm:$0xff] }
 0x235   : > { %3756 = vmatpush1.bf16.msra.mxu0 %v5679_v54  ;;  %5042 = vmatprep.subr.bf16.mxu1 %v5687_v55  ;;  %5869 = vpow2.f32 %v4616_v10  ;;  %v1414_v54 = vld [vmem:[#allocation5 + $0x218] sm:$0xff]  ;;  %v5719_v55 = vld [vmem:[%s6377_s14 + $0x618] ss:$12 sps:$4 sm:$0xff]  }
 0x236   : > { %3757 = vmatprep.subr.bf16.mxu0 %v5686_v56  ;;  %5871 = vpow2.f32 %v4615_v21  ;;  %v1509_v56 = vmul.f32 %v6815_v63, %v1377_v35  ;;  %v5733_v10 = vld [vmem:[%s6377_s14 + $0x650] ss:$12 sps:$4 sm:$0xff]   ;;  %v5738_v21 = vld [vmem:[%s6377_s14 + $0x668] ss:$12 sps:$4 sm:$0xff]   ;;  %v5751_v40 = vld [vmem:[%s6377_s14 + $0x6ac] ss:$12 sps:$4 sm:$0xff]  }
 0x237   : > { %4119 = vmatmul.mubr.bf16.gmra.mrb[64].mxu1 %v6720_v19  ;;  %v5698_v19 = vld [vmem:[%s6377_s14 + $0x4e8] ss:$12 sps:$4 sm:$0xff]   ;;  %v1392_v35 = vld [vmem:[#allocation5 + $0x168] sm:$0xff] }
 0x238   : > { %5043 = vmatpush3.bf16.msra.mxu1 %v5688_v61  ;;  %4126 = vmatprep.mubr.bf16.mxu1 %v6724_v22  ;;  %v5694_v22 = vld [vmem:[%s6377_s14 + $0x5a0] ss:$12 sps:$4 sm:$0xff]   ;;  %v5727_v61 = vld [vmem:[%s6377_s14 + $0x6f8] ss:$12 sps:$4 sm:$0xff]  }
 0x239   : > { %3758 = vmatpush1.bf16.msra.mxu0 %v5684_v4  ;;  %5044 = vmatprep.subr.bf16.mxu1 %v5692_v38  ;;  %v5726_v4 = vld [vmem:[%s6377_s14 + $0x634] ss:$12 sps:$4 sm:$0xff]   ;;  %v1012_v38 = vrot.slane %v6669_v51, %v979_v1  ;;  %v1413_v1 = vld [vmem:[#allocation5 + $0x210] sm:$0xff] }
 0x23a   : > { %3759 = vmatprep.subr.bf16.mxu0 %v5691_v6  ;;  %v1534_v6 = vmul.f32 %v6750_v23, %v1402_v53  ;;  %v5753_v53 = vld [vmem:[%s6377_s14 + $0x6b0] ss:$12 sps:$4 sm:$0xff]  }
 0x23b   : > { %v1271_v51 = vadd.f32 %v6677_v57, %v1012_v38  ;;  %v5736_v57 = vld [vmem:[%s6377_s14 + $0x664] ss:$12 sps:$4 sm:$0xff]  }
 0x23c   : > { %5045 = vmatpush3.bf16.msra.mxu1 %v5693_v7  ;;  %v1546_v7 = vmul.f32 %v6750_v23, %v1414_v54 }
 0x23d   : > { %3760 = vmatpush1.bf16.msra.mxu0 %v5689_v0  ;;  %5046 = vmatprep.subr.bf16.mxu1 %v5697_v8  ;;  %v1581_v0 = vpack.c.bf16 %v1521_v52, %v1509_v56  ;;  %v5724_v8 = vld [vmem:[%s6377_s14 + $0x630] ss:$12 sps:$4 sm:$0xff]   ;;  %v4618_v16 = vmul.f32 -1.442695, %v1271_v51  ;;  %v5749_v56 = vld [vmem:[%s6377_s14 + $0x6a8] ss:$12 sps:$4 sm:$0xff]  }
 0x23e   : > { %3761 = vmatprep.subr.bf16.mxu0 %v5696_v46  ;;  %v1594_v46 = vpack.c.bf16 %v1546_v7, %v1534_v6  ;;  %v5756_v52 = vld [vmem:[%s6377_s14 + $0x6c4] ss:$12 sps:$4 sm:$0xff]   ;;  %v1379_v6 = vld [vmem:[#allocation5 + $0x100] sm:$0xff] }
 0x23f   : > { %4127 = vmatmul.mubr.bf16.gmra.mrb[68].mxu1 %v6741_v2  ;;  %v5704_v2 = vld [vmem:[%s6377_s14 + $0x5d0] ss:$12 sps:$4 sm:$0xff]   ;;  %v5870_v11 = vpop.eup %5869 }
 0x240   : > { %5047 = vmatpush3.bf16.msra.mxu1 %v5698_v19  ;;  %4134 = vmatprep.mubr.bf16.mxu1 %v6745_v49  ;;  %v5712_v49 = vld [vmem:[%s6377_s14 + $0x5f0] ss:$12 sps:$4 sm:$0xff]   ;;  %v1320_v48 = vadd.f32 1.0, %v5870_v11  ;;  %v5872_v3 = vpop.eup %5871 }
 0x241   : > { %3762 = vmatpush1.bf16.msra.mxu0 %v5694_v22  ;;  %5048 = vmatprep.subr.bf16.mxu1 %v5702_v20  ;;  %v1319_v27 = vadd.f32 1.0, %v5872_v3  ;;  %v5732_v19 = vld [vmem:[%s6377_s14 + $0x710] ss:$12 sps:$4 sm:$0xff]   ;;  %v5729_v20 = vld [vmem:[%s6377_s14 + $0x648] ss:$12 sps:$4 sm:$0xff]  }
 0x242   : > { %3763 = vmatprep.subr.bf16.mxu0 %v5701_v14  ;;  %5873 = vrcp.f32 %v1320_v48  ;;  %v1426_v22 = vld [vmem:[#allocation5 + $0x278] sm:$0x1]  ;;  %v1545_v14 = vmul.f32 %v6815_v63, %v1413_v1  ;;  %v1367_v48 = vld [vmem:[#allocation5 + $0xa0] sm:$0xff]  ;;  %v1605_v63 = vpack.c.bf16 %v1557_v37, %v1557_v37 }
 0x243   : > { %5875 = vrcp.f32 %v1319_v27  ;;  %v1391_v7 = vld [vmem:[#allocation5 + $0x160] sm:$0xff]  ;;  %v1358_v37 = vld [vmem:[#allocation5 + $0x58] sm:$0xff] }
 0x244   : > { %5049 = vmatpush3.bf16.msra.mxu1 %v5703_v15  ;;  %v5737_v15 = vld [vmem:[%s6377_s14 + $0x728] ss:$12 sps:$4 sm:$0xff]   ;;  %5877 = vpow2.f32 %v4618_v16 }
 0x245   : > { %3764 = vmatpush1.bf16.msra.mxu0 %v5699_v17  ;;  %5050 = vmatprep.subr.bf16.mxu1 %v5707_v18  ;;  %v1558_v18 = vmul.f32 %v6750_v23, %v1426_v22  ;;  %v5758_v22 = vld [vmem:[%s6377_s14 + $0x6d8] ss:$12 sps:$4 sm:$0xff]  }
 0x246   : > { %3765 = vmatprep.subr.bf16.mxu0 %v5706_v58  ;;  %v1593_v58 = vpack.c.bf16 %v1545_v14, %v1533_v13  ;;  %v5765_v14 = vld [vmem:[%s6377_s14 + $0x7b8] ss:$12 sps:$4 sm:$0xff]  }
 0x247   : > { %4135 = vmatmul.mubr.bf16.gmra.mrb[72].mxu1 %v6764_v45  ;;  %v1510_v45 = vmul.f32 %v6750_v23, %v1378_v34  ;;  %v1606_v25 = vpack.c.bf16 %v1558_v18, %v1558_v18  ;;  %v5742_v23 = vld [vmem:[%s6377_s14 + $0x740] ss:$12 sps:$4 sm:$0xff]   ;;  %v5739_v34 = vld [vmem:[%s6377_s14 + $0x678] ss:$12 sps:$4 sm:$0xff]  }
 0x248   : > { %5051 = vmatpush3.bf16.msra.mxu1 %v5708_v5  ;;  %4174 = vmatprep.mubr.bf16.mxu1 %v6769_v47  ;;  %v5718_v47 = vld [vmem:[%s6377_s14 + $0x608] ss:$12 sps:$4 sm:$0xff]   ;;  %v1428_v18 = vld [vmem:[#allocation5 + $0x288] sm:$0x1] }
 0x249   : > { %3766 = vmatpush1.bf16.msra.mxu0 %v5704_v2  ;;  %5052 = vmatprep.subr.bf16.mxu1 %v5712_v49  ;;  %v1582_v50 = vpack.c.bf16 %v1522_v62, %v1510_v45  ;;  %v5734_v2 = vld [vmem:[%s6377_s14 + $0x660] ss:$12 sps:$4 sm:$0xff]   ;;  %v5741_v49 = vld [vmem:[%s6377_s14 + $0x67c] ss:$12 sps:$4 sm:$0xff]  }
 0x24a   : > { %3767 = vmatprep.subr.bf16.mxu0 %v5711_v28  ;;  %v1356_v28 = vld [vmem:[#allocation5 + $0x48] sm:$0xff]  ;;  %v1415_v16 = vld [vmem:[#allocation5 + $0x220] sm:$0xff] }
 0x24b   : > { %v5744_v62 = vld [vmem:[%s6377_s14 + $0x690] ss:$12 sps:$4 sm:$0xff]  }
 0x24c   : > { %5053 = vmatpush3.bf16.msra.mxu1 %v5713_v26  ;;  %v5874_v17 = vpop.eup %5873  ;;  %v1368_v26 = vld [vmem:[#allocation5 + $0xa8] sm:$0xff] }
 0x24d   : > { %3768 = vmatpush1.bf16.msra.mxu0 %v5709_v39  ;;  %5078 = vmatprep.subr.bf16.mxu1 %v5717_v42  ;;  %v6861_v5 = vrot.slane %v5874_v17, %v6389_v36  ;;  %v5876_v32 = vpop.eup %5875  ;;  %v5747_v39 = vld [vmem:[%s6377_s14 + $0x758] ss:$12 sps:$4 sm:$0xff]   ;;  %v5746_v42 = vld [vmem:[%s6377_s14 + $0x694] ss:$12 sps:$4 sm:$0xff]   ;;  %v5762_v17 = vld [vmem:[%s6377_s14 + $0x6f0] ss:$12 sps:$4 sm:$0xff]  }
 0x24e   : > { %3808 = vmatprep.subr.bf16.mxu0 %v5716_v43  ;;  %v6873_v45 = vrot.slane %v5876_v32, %v6389_v36  ;;  %v5773_v32 = vld [vmem:[%s6377_s14 + $0x7e8] ss:$12 sps:$4 sm:$0xff]  }
 0x24f   : > { %4175 = vmatmul.mubr.bf16.vlgmr.msra.gmra.mrb[76].mxu1 %v1569_v44  ;;  %v1488_v11 = vmul.f32 %v6861_v5, %v1356_v28  ;;  %v1500_v43 = vmul.f32 %v6861_v5, %v1368_v26  ;;  %v1560_v9 = vmul.f32 %v6861_v5, %v1428_v18  ;;  %v5772_v28 = vld [vmem:[%s6377_s14 + $0x724] ss:$12 sps:$4 sm:$0xff]  }
 0x250   : > { %3770 = vmatmul.mubr.bf16.vlgmr.msra.gmra.mrb[12].mxu0 %v1569_v44  ;;  %5079 = vmatpush3.bf16.msra.mxu1 %v5718_v47  ;;  %v5748_v44 = vld [vmem:[%s6377_s14 + $0x698] ss:$12 sps:$4 sm:$0xff]   ;;  %v1511_v1 = vmul.f32 %v6873_v45, %v1379_v6  ;;  %v1523_v51 = vmul.f32 %v6873_v45, %v1391_v7  ;;  %v5801_v7 = vld [vmem:[%s6377_s14 + $0x890] ss:$12 sps:$4 sm:$0xff]  }
 0x251   : > { %3779 = vmatprep.mubr.bf16.mxu0 %v1582_v50  ;;  %3809 = vmatpush1.bf16.msra.mxu0 %v5714_v41  ;;  %v1355_v47 = vld [vmem:[#allocation5 + $0x40] sm:$0xff]  ;;  %v1572_v3 = vpack.c.bf16 %v1500_v43, %v1488_v11  ;;  %v4617_v43 = vmul.f32 -1.442695, %v6679_v60 }
 0x252   : > { %4182 = vmatprep.mubr.bf16.mxu1 %v1582_v50  ;;  %3810 = vmatprep.subr.bf16.mxu0 %v5721_v12  ;;  %v5752_v41 = vld [vmem:[%s6377_s14 + $0x770] ss:$12 sps:$4 sm:$0xff]   ;;  %v1487_v50 = vmul.f32 %v6873_v45, %v1355_v47  ;;  %v6904_v13 = vpack.c.bf16 %v1523_v51, %v1511_v1  ;;  %v1427_v11 = vld [vmem:[#allocation5 + $0x280] sm:$0x1] }
 0x253   : > { %5080 = vmatprep.subr.bf16.mxu1 %v5722_v29  ;;  %v1380_v12 = vld [vmem:[#allocation5 + $0x108] sm:$0xff]  ;;  %v1499_v29 = vmul.f32 %v6873_v45, %v1367_v48 }
 0x254   : > { %5081 = vmatpush3.bf16.msra.mxu1 %v5723_v33  ;;  %v5878_v33 = vpop.eup %5877  ;;  %v1512_v54 = vmul.f32 %v6861_v5, %v1380_v12  ;;  %v5774_v48 = vld [vmem:[%s6377_s14 + $0x738] ss:$12 sps:$4 sm:$0xff]   ;;  %v5808_v51 = vld [vmem:[%s6377_s14 + $0x7fc] ss:$12 sps:$4 sm:$0xff]  }
 0x255   : > { %3811 = vmatpush1.bf16.msra.mxu0 %v5719_v55  ;;  %5082 = vmatprep.subr.bf16.mxu1 %v5727_v61  ;;  %v1524_v55 = vmul.f32 %v6861_v5, %v1392_v35  ;;  %v6886_v61 = vpack.c.bf16 %v1499_v29, %v1487_v50  ;;  %v1322_v27 = vadd.f32 1.0, %v5878_v33  ;;  %v5781_v60 = vld [vmem:[%s6377_s14 + $0x818] ss:$12 sps:$4 sm:$0xff]   ;;  %v5778_v35 = vld [vmem:[%s6377_s14 + $0x750] ss:$12 sps:$4 sm:$0xff]  }
 0x256   : > { %3812 = vmatprep.subr.bf16.mxu0 %v5726_v4  ;;  %v5757_v4 = vld [vmem:[%s6377_s14 + $0x788] ss:$12 sps:$4 sm:$0xff]   ;;  %v5788_v29 = vld [vmem:[%s6377_s14 + $0x784] ss:$12 sps:$4 sm:$0xff]  }
 0x257   : > { %4183 = vmatmul.mubr.bf16.gmra.mrb[80].mxu1 %v1581_v0  ;;  %v6889_v38 = vpack.c.bf16 %v1524_v55, %v1512_v54  ;;  %5879 = vrcp.f32 %v1322_v27  ;;  %v5782_v50 = vld [vmem:[%s6377_s14 + $0x768] ss:$12 sps:$4 sm:$0xff]   ;;  %v5786_v54 = vld [vmem:[%s6377_s14 + $0x780] ss:$12 sps:$4 sm:$0xff]   ;;  %v5790_v27 = vld [vmem:[%s6377_s14 + $0x798] ss:$12 sps:$4 sm:$0xff]  }
 0x258   : > { %3780 = vmatmul.mubr.bf16.gmra.mrb[16].mxu0 %v1581_v0  ;;  %5083 = vmatpush3.bf16.msra.mxu1 %v5728_v30  ;;  %v5754_v30 = vld [vmem:[%s6377_s14 + $0x6c0] ss:$12 sps:$4 sm:$0xff]   ;;  %v6118_v0 = vmov 0   ;;  %5881 = vpow2.f32 %v4617_v43  ;;  %v5789_v33 = vld [vmem:[%s6377_s14 + $0x848] ss:$12 sps:$4 sm:$0xff]  }
 0x259   : > { %3789 = vmatprep.mubr.bf16.mxu0 %v1594_v46  ;;  %3813 = vmatpush1.bf16.msra.mxu0 %v5724_v8  ;;  %v1404_v8 = vld [vmem:[#allocation5 + $0x1c8] sm:$0xff] }
 0x25a   : > { %4190 = vmatprep.mubr.bf16.mxu1 %v1594_v46  ;;  %3814 = vmatprep.subr.bf16.mxu0 %v5731_v59  ;;  %v1416_v59 = vld [vmem:[#allocation5 + $0x228] sm:$0xff] }
 0x25b   : > { %5084 = vmatprep.subr.bf16.mxu1 %v5732_v19  ;;  %v5761_v46 = vld [vmem:[%s6377_s14 + $0x7a0] ss:$12 sps:$4 sm:$0xff]   ;;  %v1536_v19 = vmul.f32 %v6861_v5, %v1404_v8  ;;  %v5792_v55 = vld [vmem:[%s6377_s14 + $0x79c] ss:$12 sps:$4 sm:$0xff]   ;;  %v5797_v6 = vld [vmem:[%s6377_s14 + $0x878] ss:$12 sps:$4 sm:$0xff]  }
 0x25c   : > { %5085 = vmatpush3.bf16.msra.mxu1 %v5733_v10  ;;  %v1548_v10 = vmul.f32 %v6861_v5, %v1416_v59  ;;  %v5770_v5 = vld [vmem:[%s6377_s14 + $0x720] ss:$12 sps:$4 sm:$0xff]   ;;  %v5804_v8 = vld [vmem:[%s6377_s14 + $0x7e4] ss:$12 sps:$4 sm:$0xff]   ;;  %v5805_v59 = vld [vmem:[%s6377_s14 + $0x8a8] ss:$12 sps:$4 sm:$0xff]  }
 0x25d   : > { %3815 = vmatpush1.bf16.msra.mxu0 %v5729_v20  ;;  %5086 = vmatprep.subr.bf16.mxu1 %v5737_v15  ;;  %v5764_v20 = vld [vmem:[%s6377_s14 + $0x6f4] ss:$12 sps:$4 sm:$0xff]   ;;  %v5810_v18 = vld [vmem:[%s6377_s14 + $0x810] ss:$12 sps:$4 sm:$0xff]  }
 0x25e   : > { %3816 = vmatprep.subr.bf16.mxu0 %v5736_v57  ;;  %v6907_v15 = vpack.c.bf16 %v1548_v10, %v1536_v19  ;;  %v1403_v57 = vld [vmem:[#allocation5 + $0x1c0] sm:$0xff] }
 0x25f   : > { %4191 = vmatmul.mubr.bf16.gmra.mrb[84].mxu1 %v1593_v58  ;;  %v5806_v10 = vld [vmem:[%s6377_s14 + $0x7f8] ss:$12 sps:$4 sm:$0xff]  }
 0x260   : > { %3790 = vmatmul.mubr.bf16.gmra.mrb[20].mxu0 %v1593_v58  ;;  %5087 = vmatpush3.bf16.msra.mxu1 %v5738_v21  ;;  %v5768_v21 = vld [vmem:[%s6377_s14 + $0x70c] ss:$12 sps:$4 sm:$0xff]   ;;  %v1535_v58 = vmul.f32 %v6873_v45, %v1403_v57 }
 0x261   : > { %3799 = vmatprep.mubr.bf16.mxu0 %v1606_v25  ;;  %3817 = vmatpush1.bf16.msra.mxu0 %v5734_v2  ;;  %v1547_v2 = vmul.f32 %v6873_v45, %v1415_v16  ;;  %v1382_v57 = vld [vmem:[#allocation5 + $0x118] sm:$0xff] }
 0x262   : > { %4198 = vmatprep.mubr.bf16.mxu1 %v1606_v25  ;;  %3818 = vmatprep.subr.bf16.mxu0 %v5741_v49  ;;  %v5769_v49 = vld [vmem:[%s6377_s14 + $0x7d0] ss:$12 sps:$4 sm:$0xff]   ;;  %v5880_v25 = vpop.eup %5879 }
 0x263   : > { %5088 = vmatprep.subr.bf16.mxu1 %v5742_v23  ;;  %v5766_v23 = vld [vmem:[%s6377_s14 + $0x708] ss:$12 sps:$4 sm:$0xff]   ;;  %v6921_v26 = vpack.c.bf16 %v1547_v2, %v1535_v58 }
 0x264   : > { %5089 = vmatpush3.bf16.msra.mxu1 %v5743_v31  ;;  %v6925_v31 = vrot.slane %v5880_v25, %v6389_v36  ;;  %v1394_v16 = vld [vmem:[#allocation5 + $0x178] sm:$0xff] }
 0x265   : > { %3819 = vmatpush1.bf16.msra.mxu0 %v5739_v34  ;;  %5090 = vmatprep.subr.bf16.mxu1 %v5747_v39  ;;  %v6927_v34 = vpack.c.bf16 %v1560_v9, %v1560_v9  ;;  %v1370_v39 = vld [vmem:[#allocation5 + $0xb8] sm:$0xff] }
 0x266   : > { %3820 = vmatprep.subr.bf16.mxu0 %v5746_v42  ;;  %v5776_v42 = vld [vmem:[%s6377_s14 + $0x73c] ss:$12 sps:$4 sm:$0xff]   ;;  %v1502_v47 = vmul.f32 %v6925_v31, %v1370_v39  ;;  %v5816_v9 = vld [vmem:[%s6377_s14 + $0x82c] ss:$12 sps:$4 sm:$0xff]   ;;  %v1514_v25 = vmul.f32 %v6925_v31, %v1382_v57 }
 0x267   : > { %4199 = vmatmul.mubr.bf16.gmra.mrb[88].mxu1 %v1605_v63 }
 0x268   : > { %3800 = vmatmul.mubr.bf16.gmra.mrb[24].mxu0 %v1605_v63  ;;  %5091 = vmatpush3.bf16.msra.mxu1 %v5748_v44  ;;  %v1490_v44 = vmul.f32 %v6925_v31, %v1358_v37  ;;  %v1559_v63 = vmul.f32 %v6873_v45, %v1427_v11  ;;  %v5784_v45 = vld [vmem:[%s6377_s14 + $0x76c] ss:$12 sps:$4 sm:$0xff]  }
 0x269   : > { %3821 = vmatpush1.bf16.msra.mxu0 %v5744_v62  ;;  %5092 = vmatprep.subr.bf16.mxu1 %v5752_v41  ;;  %v5777_v62 = vld [vmem:[%s6377_s14 + $0x800] ss:$12 sps:$4 sm:$0xff]  }
 0x26a   : > { %3822 = vmatprep.subr.bf16.mxu0 %v5751_v40  ;;  %4238 = vmatprep.mubr.bf16.mxu1 %v1572_v3  ;;  %v5780_v41 = vld [vmem:[%s6377_s14 + $0x754] ss:$12 sps:$4 sm:$0xff]   ;;  %v6943_v12 = vpack.c.bf16 %v1502_v47, %v1490_v44  ;;  %v6947_v40 = vpack.c.bf16 %v1559_v63, %v1559_v63  ;;  %v1393_v37 = vld [vmem:[#allocation5 + $0x170] sm:$0xff] }
 0x26b   : > { %3840 = vmatprep.mubr.bf16.mxu0 %v1572_v3  ;;  %v5785_v3 = vld [vmem:[%s6377_s14 + $0x830] ss:$12 sps:$4 sm:$0xff]  }
 0x26c   : > { %5093 = vmatpush3.bf16.msra.mxu1 %v5753_v53  ;;  %v5882_v53 = vpop.eup %5881  ;;  %v1418_v11 = vld [vmem:[#allocation5 + $0x238] sm:$0xff]  ;;  %v5822_v63 = vld [vmem:[%s6377_s14 + $0x85c] ss:$12 sps:$4 sm:$0xff]  }
 0x26d   : > { %3823 = vmatpush1.bf16.msra.mxu0 %v5749_v56  ;;  %4270 = vmatprep.subr.bf16.mxu1 %v6118_v0  ;;  %v1321_v56 = vadd.f32 1.0, %v5882_v53  ;;  %v1430_v53 = vld [vmem:[#allocation5 + $0x298] sm:$0x1] }
 0x26e   : > { %3824 = vmatprep.subr.bf16.mxu0 %v5756_v52  ;;  %v5793_v52 = vld [vmem:[%s6377_s14 + $0x860] ss:$12 sps:$4 sm:$0xff]  }
 0x26f   : > { %4239 = vmatmul.mubr.bf16.vlgmr.msra.gmra.mrb[92].mxu1 %v6886_v61  ;;  %5883 = vrcp.f32 %v1321_v56 }
 0x270   : > { %4271 = vmatpush1.bf16.msra.mxu1 %v5757_v4  ;;  %4246 = vmatprep.mubr.bf16.mxu1 %v6889_v38  ;;  %v5796_v4 = vld [vmem:[%s6377_s14 + $0x7b4] ss:$12 sps:$4 sm:$0xff]  }
 0x271   : > { %3825 = vmatpush1.bf16.msra.mxu0 %v5754_v30  ;;  %4272 = vmatprep.subr.bf16.mxu1 %v6118_v0  ;;  %v5798_v30 = vld [vmem:[%s6377_s14 + $0x7c8] ss:$12 sps:$4 sm:$0xff]  }
 0x272   : > { %3826 = vmatprep.subr.bf16.mxu0 %v5760_v24  ;;  %v5802_v24 = vld [vmem:[%s6377_s14 + $0x7e0] ss:$12 sps:$4 sm:$0xff]  }
 0x274   : > { %4273 = vmatpush1.bf16.msra.mxu1 %v5761_v46  ;;  %v5809_v46 = vld [vmem:[%s6377_s14 + $0x8c0] ss:$12 sps:$4 sm:$0xff]  }
 0x275   : > { %3827 = vmatpush1.bf16.msra.mxu0 %v5758_v22  ;;  %4274 = vmatprep.subr.bf16.mxu1 %v6118_v0  ;;  %v5813_v22 = vld [vmem:[%s6377_s14 + $0x8d8] ss:$0 sps:$4 sm:$0xff]  }
 0x276   : > { %3828 = vmatprep.subr.bf16.mxu0 %v5764_v20  ;;  %v5812_v20 = vld [vmem:[%s6377_s14 + $0x814] ss:$12 sps:$4 sm:$0xff]  }
 0x277   : > { %4247 = vmatmul.mubr.bf16.gmra.mrb[96].mxu1 %v6904_v13 }
 0x278   : > { %4275 = vmatpush1.bf16.msra.mxu1 %v5765_v14  ;;  %4254 = vmatprep.mubr.bf16.mxu1 %v6907_v15  ;;  %v1369_v14 = vld [vmem:[#allocation5 + $0xb0] sm:$0xff] }
 0x279   : > { %3829 = vmatpush1.bf16.msra.mxu0 %v5762_v17  ;;  %4276 = vmatprep.subr.bf16.mxu1 %v6118_v0  ;;  %v5884_v1 = vpop.eup %5883 }
 0x27a   : > { %3830 = vmatprep.subr.bf16.mxu0 %v5768_v21  ;;  %v6984_v19 = vrot.slane %v5884_v1, %v6389_v36  ;;  %v3522_v21 = vsel %vm3514_vm2, %v5813_v22, 0  ;;  %v1987_v22 = vld [vmem:[%s6377_s14 + $0x8d0] sm:$0xff] }
 0x27b   : > { %v4902_v57 = vcombine.high %v1987_v22, %v1987_v22 }
 0x27c   : > { %4277 = vmatpush1.bf16.msra.mxu1 %v5769_v49  ;;  %v1501_v2 = vmul.f32 %v6984_v19, %v1369_v14  ;;  %v1525_v47 = vmul.f32 %v6984_v19, %v1393_v37 }
 0x27d   : > { %3831 = vmatpush1.bf16.msra.mxu0 %v5766_v23  ;;  %4278 = vmatprep.subr.bf16.mxu1 %v6118_v0  ;;  %v1526_v23 = vmul.f32 %v6925_v31, %v1394_v16  ;;  %v4901_v16 = vcombine.low %v1987_v22, %v1987_v22 }
 0x27e   : > { %3832 = vmatprep.subr.bf16.mxu0 %v5772_v28 }
 0x27f   : > { %4255 = vmatmul.mubr.bf16.gmra.mrb[100].mxu1 %v6921_v26 }
 0x280   : > { %4279 = vmatpush1.bf16.msra.mxu1 %v5773_v32  ;;  %4262 = vmatprep.mubr.bf16.mxu1 %v6927_v34  ;;  %v5819_v32 = vld [vmem:[%s6377_s14 + $0x844] ss:$12 sps:$4 sm:$0xff]  }
 0x281   : > { %3833 = vmatpush1.bf16.msra.mxu0 %v5770_v5  ;;  %4280 = vmatprep.subr.bf16.mxu1 %v6118_v0  ;;  %v1381_v5 = vld [vmem:[#allocation5 + $0x110] sm:$0xff] }
 0x282   : > { %3834 = vmatprep.subr.bf16.mxu0 %v5776_v42  ;;  %v1406_v42 = vld [vmem:[#allocation5 + $0x1d8] sm:$0xff]  ;;  %v1513_v44 = vmul.f32 %v6984_v19, %v1381_v5 }
 0x284   : > { %4281 = vmatpush1.bf16.msra.mxu1 %v5777_v62  ;;  %v5817_v62 = vld [vmem:[%s6377_s14 + $0x840] ss:$12 sps:$4 sm:$0xff]  }
 0x285   : > { %3835 = vmatpush1.bf16.msra.mxu0 %v5774_v48  ;;  %4282 = vmatprep.subr.bf16.mxu1 %v6118_v0 }
 0x286   : > { %3836 = vmatprep.subr.bf16.mxu0 %v5780_v41  ;;  %v1538_v41 = vmul.f32 %v6925_v31, %v1406_v42 }
 0x287   : > { %4263 = vmatmul.mubr.bf16.gmra.mrb[104].mxu1 %v6947_v40 }
 0x288   : > { %4283 = vmatpush1.bf16.msra.mxu1 %v5781_v60  ;;  %4909 = vmatprep.mubr.msk.bf16.mxu1 %vm3501_vm1, %v6943_v12  ;;  %v1550_v60 = vmul.f32 %v6925_v31, %v1418_v11 }
 0x289   : > { %3837 = vmatpush1.bf16.msra.mxu0 %v5778_v35  ;;  %4284 = vmatprep.subr.bf16.mxu1 %v6118_v0  ;;  %v7034_v35 = vpack.c.bf16 %v1525_v47, %v1513_v44 }
 0x28a   : > { %3838 = vmatprep.subr.bf16.mxu0 %v5784_v45 }
 0x28c   : > { %4285 = vmatpush1.bf16.msra.mxu1 %v5785_v3  ;;  %v5825_v3 = vld [vmem:[%s6377_s14 + $0x874] ss:$12 sps:$4 sm:$0xff]  }
 0x28d   : > { %3839 = vmatpush1.bf16.msra.mxu0 %v5782_v50  ;;  %4286 = vmatprep.subr.bf16.mxu1 %v6118_v0  ;;  %v1405_v50 = vld [vmem:[#allocation5 + $0x1d0] sm:$0xff] }
 0x28e   : > { %3879 = vmatprep.subr.bf16.mxu0 %v5788_v29  ;;  %v1417_v29 = vld [vmem:[#allocation5 + $0x230] sm:$0xff] }
 0x290   : > { %3841 = vmatmul.mubr.bf16.vlgmr.msra.gmra.mrb[12].mxu0 %v6886_v61  ;;  %4287 = vmatpush1.bf16.msra.mxu1 %v5789_v33  ;;  %v5794_v61 = vld [vmem:[%s6377_s14 + $0x7b0] ss:$12 sps:$4 sm:$0xff]  }
 0x291   : > { %3850 = vmatprep.mubr.bf16.mxu0 %v6889_v38  ;;  %3880 = vmatpush1.bf16.msra.mxu0 %v5786_v54  ;;  %v5800_v38 = vld [vmem:[%s6377_s14 + $0x7cc] ss:$12 sps:$4 sm:$0xff]  }
 0x292   : > { %3881 = vmatprep.subr.bf16.mxu0 %v5792_v55  ;;  %4288 = vmatprep.subr.bf16.mxu1 %v6118_v0  ;;  %v5823_v55 = vld [vmem:[%s6377_s14 + $0x870] ss:$12 sps:$4 sm:$0xff]  }
 0x294   : > { %4289 = vmatpush1.bf16.msra.mxu1 %v5793_v52  ;;  %v1537_v52 = vmul.f32 %v6984_v19, %v1405_v50 }
 0x295   : > { %3882 = vmatpush1.bf16.msra.mxu0 %v5790_v27  ;;  %4290 = vmatprep.subr.bf16.mxu1 %v6118_v0  ;;  %v1549_v27 = vmul.f32 %v6984_v19, %v1417_v29 }
 0x296   : > { %3883 = vmatprep.subr.bf16.mxu0 %v5796_v4  ;;  %v5828_v4 = vld [vmem:[%s6377_s14 + $0x88c] ss:$12 sps:$4 sm:$0xff]  }
 0x298   : > { %3851 = vmatmul.mubr.bf16.gmra.mrb[16].mxu0 %v6904_v13  ;;  %4291 = vmatpush1.bf16.msra.mxu1 %v5797_v6  ;;  %v1357_v13 = vld [vmem:[#allocation5 + $0x50] sm:$0xff]  ;;  %v1562_v6 = vmul.f32 %v6925_v31, %v1430_v53 }
 0x299   : > { %3860 = vmatprep.mubr.bf16.mxu0 %v6907_v15  ;;  %3884 = vmatpush1.bf16.msra.mxu0 %v5794_v61  ;;  %v1489_v58 = vmul.f32 %v6984_v19, %v1357_v13  ;;  %v5826_v61 = vld [vmem:[%s6377_s14 + $0x888] ss:$12 sps:$4 sm:$0xff]  }
 0x29a   : > { %3885 = vmatprep.subr.bf16.mxu0 %v5800_v38  ;;  %4292 = vmatprep.subr.bf16.mxu1 %v6118_v0  ;;  %v1597_v38 = vpack.c.bf16 %v1549_v27, %v1537_v52 }
 0x29b   : > { %v7011_v28 = vpack.c.bf16 %v1501_v2, %v1489_v58 }
 0x29c   : > { %4293 = vmatpush1.bf16.msra.mxu1 %v5801_v7 }
 0x29d   : > { %3886 = vmatpush1.bf16.msra.mxu0 %v5798_v30  ;;  %4294 = vmatprep.subr.bf16.mxu1 %v6118_v0  ;;  %v1610_v30 = vpack.c.bf16 %v1562_v6, %v1562_v6 }
 0x29e   : > { %3887 = vmatprep.subr.bf16.mxu0 %v5804_v8  ;;  %v5831_v8 = vld [vmem:[%s6377_s14 + $0x8a4] ss:$12 sps:$4 sm:$0xff]  }
 0x2a0   : > { %3861 = vmatmul.mubr.bf16.gmra.mrb[20].mxu0 %v6921_v26  ;;  %4295 = vmatpush1.bf16.msra.mxu1 %v5805_v59  ;;  %v7013_v26 = vpack.c.bf16 %v1526_v23, %v1514_v25  ;;  %v1429_v59 = vld [vmem:[#allocation5 + $0x290] sm:$0x1] }
 0x2a1   : > { %3870 = vmatprep.mubr.bf16.mxu0 %v6927_v34  ;;  %3888 = vmatpush1.bf16.msra.mxu0 %v5802_v24 }
 0x2a2   : > { %3889 = vmatprep.subr.bf16.mxu0 %v5808_v51  ;;  %4296 = vmatprep.subr.bf16.mxu1 %v6118_v0  ;;  %v6991_v15 = vpop.f32.mrb[12].mxu1  ;;  %v5829_v51 = vld [vmem:[%s6377_s14 + $0x8a0] ss:$12 sps:$4 sm:$0xff]  }
 0x2a3   : > { %v6993_v36 = vpop.f32.mrb[13].mxu1 }
 0x2a4   : > { %4297 = vmatpush1.bf16.msra.mxu1 %v5809_v46  ;;  %v6995_v17 = vpop.f32.mrb[14].mxu1  ;;  %v1561_v46 = vmul.f32 %v6984_v19, %v1429_v59  ;;  %v3516_v19 = vsel %vm3514_vm2, %v4901_v16, 0 }
 0x2a5   : > { %3890 = vmatpush1.bf16.msra.mxu0 %v5806_v10  ;;  %4298 = vmatprep.subr.bf16.mxu1 %v6118_v0  ;;  %v7002_v49 = vpop.f32.mrb[15].mxu1  ;;  %v5814_v0 = vld [vmem:[%s6377_s14 + $0x828] ss:$12 sps:$4 sm:$0xff]  }
 0x2a6   : > { %3891 = vmatprep.subr.bf16.mxu0 %v5812_v20  ;;  %v5834_v10 = vld [vmem:[%s6377_s14 + $0x8bc] ss:$12 sps:$4 sm:$0xff]   ;;  %v5832_v20 = vld [vmem:[%s6377_s14 + $0x8b8] ss:$12 sps:$4 sm:$0xff]   ;;  %v1609_v13 = vpack.c.bf16 %v1561_v46, %v1561_v46 }
 0x2a8   : > { %3871 = vmatmul.mubr.bf16.gmra.mrb[24].mxu0 %v6947_v40  ;;  %4299 = vmatpush1.bf16.msra.mxu1 %v3522_v21  ;;  %v7036_v40 = vpack.c.bf16 %v1550_v60, %v1538_v41 }
 0x2a9   : > { %3892 = vmatpush1.bf16.msra.mxu0 %v5810_v18  ;;  %4905 = vmatprep.mubr.msk.bf16.mxu0 %vm3501_vm1, %v6943_v12  ;;  %v5820_v12 = vld [vmem:[%s6377_s14 + $0x858] ss:$12 sps:$4 sm:$0xff]  }
 0x2aa   : > { %3893 = vmatprep.subr.bf16.mxu0 %v5816_v9  ;;  %v7016_v34 = vpop.f32.mrb[16].mxu1 }
 0x2ab   : > { %4303 = vmatmul.mubr.bf16.vlgmr.msra.gmra.mrb[108].mxu1 %v7011_v28  ;;  %v7019_v39 = vpop.f32.mrb[17].mxu1 }
 0x2ac   : > { %4910 = vmatprep.mubr.msk.bf16.mxu1 %vm3501_vm1, %v7013_v26  ;;  %v7023_v43 = vpop.f32.mrb[18].mxu1 }
 0x2ad   : > { %3894 = vmatpush1.bf16.msra.mxu0 %v5814_v0  ;;  %v7028_v48 = vpop.f32.mrb[19].mxu1 }
 0x2ae   : > { %3895 = vmatprep.subr.bf16.mxu0 %v5819_v32 }
 0x2b1   : > { %3896 = vmatpush1.bf16.msra.mxu0 %v5817_v62 }
 0x2b2   : > { %3897 = vmatprep.subr.bf16.mxu0 %v5822_v63  ;;  %v7038_v45 = vpop.f32.mrb[20].mxu1 }
 0x2b3   : > { %4311 = vmatmul.mubr.bf16.gmra.mrb[112].mxu1 %v7034_v35  ;;  %v7042_v33 = vpop.f32.mrb[21].mxu1 }
 0x2b4   : > { %4911 = vmatprep.mubr.msk.bf16.mxu1 %vm3501_vm1, %v7036_v40  ;;  %v7046_v54 = vpop.f32.mrb[22].mxu1 }
 0x2b5   : > { %3898 = vmatpush1.bf16.msra.mxu0 %v5820_v12  ;;  %v7049_v56 = vpop.f32.mrb[23].mxu1 }
 0x2b6   : > { %3899 = vmatprep.subr.bf16.mxu0 %v5825_v3 }
 0x2b9   : > { %3900 = vmatpush1.bf16.msra.mxu0 %v5823_v55 }
 0x2ba   : > { %v7056_v7 = vpop.f32.mrb[24].mxu1  ;;  %3901 = vmatprep.subr.bf16.mxu0 %v5828_v4 }
 0x2bb   : > { %4319 = vmatmul.mubr.bf16.gmra.mrb[116].mxu1 %v1597_v38  ;;  %v7059_v24 = vpop.f32.mrb[25].mxu1 }
 0x2bc   : > { %4912 = vmatprep.mubr.msk.bf16.mxu1 %vm3501_vm1, %v1610_v30  ;;  %v3592_v1 = vpop.f32.mrb[26].mxu1 }
 0x2bd   : > { %3902 = vmatpush1.bf16.msra.mxu0 %v5826_v61  ;;  %v3593_v31 = vpop.f32.mrb[27].mxu1 }
 0x2be   : > { %3903 = vmatprep.subr.bf16.mxu0 %v5831_v8 }
 0x2c1   : > { %3904 = vmatpush1.bf16.msra.mxu0 %v5829_v51 }
 0x2c2   : > { %3905 = vmatprep.subr.bf16.mxu0 %v5834_v10  ;;  %v4934_v14 = vpop.f32.mrb[28].mxu1 }
 0x2c3   : > { %4327 = vmatmul.mubr.bf16.gmra.mrb[120].mxu1 %v1609_v13  ;;  %v4935_v18 = vpop.f32.mrb[29].mxu1 }
 0x2c4   : > { %v4936_v21 = vadd.f32 %v4935_v18, %v4934_v14  ;;  %v4937_v58 = vpop.f32.mrb[30].mxu1 }
 0x2c5   : > { %3906 = vmatpush1.bf16.msra.mxu0 %v5832_v20  ;;  %v4938_v2 = vpop.f32.mrb[31].mxu1 }
 0x2c6   : > { %v4939_v9 = vadd.f32 %v4938_v2, %v4937_v58  ;;  %4904 = vmatprep.subr.msk.bf16.mxu0 %vm3514_vm2, %v4902_v57 }
 0x2c9   : > { %3908 = vmatpush1.bf16.msra.mxu0 %v3516_v19 }
 0x2ca   : > { %v4940_v25 = vpop.f32.mrb[32].mxu1 }
 0x2cb   : > { %v4941_v23 = vpop.f32.mrb[33].mxu1 }
 0x2cc   : > { %3912 = vmatmul.mubr.bf16.vlgmr.msra.gmra.mrb[12].mxu0 %v7011_v28  ;;  %v4942_v0 = vadd.f32 %v4941_v23, %v4940_v25  ;;  %v4943_v32 = vpop.f32.mrb[34].mxu1 }
 0x2cd   : > { %4906 = vmatprep.mubr.msk.bf16.mxu0 %vm3501_vm1, %v7013_v26  ;;  %v4944_v5 = vpop.f32.mrb[35].mxu1 }
 0x2ce   : > { %v4945_v37 = vadd.f32 %v4944_v5, %v4943_v32 }
 0x2d2   : > { %v4946_v42 = vpop.f32.mrb[36].mxu1 }
 0x2d3   : > { %v4947_v11 = vpop.f32.mrb[37].mxu1 }
 0x2d4   : > { %3922 = vmatmul.mubr.bf16.gmra.mrb[16].mxu0 %v7034_v35  ;;  %v4948_v62 = vadd.f32 %v4947_v11, %v4946_v42  ;;  %v4949_v44 = vpop.f32.mrb[38].mxu1 }
 0x2d5   : > { %4907 = vmatprep.mubr.msk.bf16.mxu0 %vm3501_vm1, %v7036_v40  ;;  %v4950_v47 = vpop.f32.mrb[39].mxu1 }
 0x2d6   : > { %v4951_v63 = vadd.f32 %v4950_v47, %v4949_v44 }
 0x2da   : > { %v4952_v41 = vpop.f32.mrb[40].mxu1 }
 0x2db   : > { %v4953_v28 = vpop.f32.mrb[41].mxu1 }
 0x2dc   : > { %3932 = vmatmul.mubr.bf16.gmra.mrb[20].mxu0 %v1597_v38  ;;  %v4954_v60 = vadd.f32 %v4953_v28, %v4952_v41  ;;  %v4955_v12 = vpop.f32.mrb[42].mxu1 }
 0x2dd   : > { %4908 = vmatprep.mubr.msk.bf16.mxu0 %vm3501_vm1, %v1610_v30  ;;  %v4956_v26 = vpop.f32.mrb[43].mxu1 }
 0x2e2   : > { %v4974_v3 = vpop.f32.mrb[44].mxu1 }
 0x2e3   : > { %v4975_v50 = vpop.f32.mrb[45].mxu1 }
 0x2e4   : > { %3942 = vmatmul.mubr.bf16.gmra.mrb[24].mxu0 %v1609_v13  ;;  %v4976_v29 = vadd.f32 %v4975_v50, %v4974_v3  ;;  %v4977_v35 = vpop.f32.mrb[46].mxu1 }
 0x2e5   : > { %v4978_v53 = vpop.f32.mrb[47].mxu1 }
 0x2e6   : > { %v4049_v55 = vadd.f32 %v4976_v29, %v4936_v21  ;;  %v4979_v52 = vadd.f32 %v4978_v53, %v4977_v35 }
 0x2e8   : > { %v4052_v27 = vadd.f32 %v4979_v52, %v4939_v9 }
 0x2ea   : > { %v4980_v40 = vpop.f32.mrb[48].mxu1 }
 0x2eb   : > { %v4981_v4 = vpop.f32.mrb[49].mxu1 }
 0x2ec   : > { %v4982_v6 = vadd.f32 %v4981_v4, %v4980_v40  ;;  %v4983_v61 = vpop.f32.mrb[50].mxu1 }
 0x2ed   : > { %v4984_v8 = vpop.f32.mrb[51].mxu1 }
 0x2ee   : > { %v4057_v38 = vadd.f32 %v4982_v6, %v4942_v0  ;;  %v4985_v59 = vadd.f32 %v4984_v8, %v4983_v61 }
 0x2f0   : > { %v4060_v1 = vadd.f32 %v4985_v59, %v4945_v37 }
 0x2f2   : > { %v4986_v31 = vpop.f32.mrb[52].mxu1 }
 0x2f3   : > { %v4987_v30 = vpop.f32.mrb[53].mxu1 }
 0x2f4   : > { %v4988_v51 = vadd.f32 %v4987_v30, %v4986_v31  ;;  %v4989_v46 = vpop.f32.mrb[54].mxu1 }
 0x2f5   : > { %v4990_v10 = vpop.f32.mrb[55].mxu1 }
 0x2f6   : > { %v4065_v22 = vadd.f32 %v4988_v51, %v4948_v62  ;;  %v4991_v20 = vadd.f32 %v4990_v10, %v4989_v46 }
 0x2f8   : > { %v4068_v13 = vadd.f32 %v4991_v20, %v4951_v63 }
 0x2fa   : > { %v4992_v14 = vpop.f32.mrb[56].mxu1 }
 0x2fb   : > { %v4993_v57 = vpop.f32.mrb[57].mxu1 }
 0x2fc   : > { %v4994_v16 = vadd.f32 %v4993_v57, %v4992_v14  ;;  %v4995_v18 = vpop.f32.mrb[58].mxu1 }
 0x2fd   : > { %v4996_v21 = vpop.f32.mrb[59].mxu1 }
 0x2fe   : > { %v4073_v58 = vadd.f32 %v4994_v16, %v4954_v60 }
 0x302   : > { %v5014_v2 = vpop.f32.mrb[60].mxu1 }
 0x303   : > { %v5015_v9 = vpop.f32.mrb[61].mxu1 }
 0x304   : > { %v5016_v19 = vadd.f32 %v5015_v9, %v5014_v2  ;;  %v5017_v25 = vpop.f32.mrb[62].mxu1 }
 0x305   : > { %v5018_v23 = vpop.f32.mrb[63].mxu1 }
 0x306   : > { %v4113_v0 = vadd.f32 %v5016_v19, %v4049_v55  ;;  %v5019_v32 = vadd.f32 %v5018_v23, %v5017_v25 }
 0x308   : > { %v4116_v5 = vadd.f32 %v5019_v32, %v4052_v27 }
 0x30a   : > { %v5020_v37 = vpop.f32.mrb[64].mxu1 }
 0x30b   : > { %v5021_v42 = vpop.f32.mrb[65].mxu1 }
 0x30c   : > { %v5022_v11 = vadd.f32 %v5021_v42, %v5020_v37  ;;  %v5023_v62 = vpop.f32.mrb[66].mxu1 }
 0x30d   : > { %v5024_v44 = vpop.f32.mrb[67].mxu1 }
 0x30e   : > { %v4121_v47 = vadd.f32 %v5022_v11, %v4057_v38  ;;  %v5025_v63 = vadd.f32 %v5024_v44, %v5023_v62 }
 0x310   : > { %v4124_v41 = vadd.f32 %v5025_v63, %v4060_v1 }
 0x312   : > { %v5026_v28 = vpop.f32.mrb[68].mxu1 }
 0x313   : > { %v5027_v12 = vpop.f32.mrb[69].mxu1 }
 0x314   : > { %v5028_v26 = vadd.f32 %v5027_v12, %v5026_v28  ;;  %v5029_v60 = vpop.f32.mrb[70].mxu1 }
 0x315   : > { %v5030_v3 = vpop.f32.mrb[71].mxu1 }
 0x316   : > { %v4129_v50 = vadd.f32 %v5028_v26, %v4065_v22  ;;  %v5031_v29 = vadd.f32 %v5030_v3, %v5029_v60 }
 0x318   : > { %v4132_v35 = vadd.f32 %v5031_v29, %v4068_v13 }
 0x31a   : > { %v5032_v53 = vpop.f32.mrb[72].mxu1 }
 0x31b   : > { %v5033_v55 = vpop.f32.mrb[73].mxu1 }
 0x31c   : > { %v5034_v52 = vadd.f32 %v5033_v55, %v5032_v53  ;;  %v5035_v27 = vpop.f32.mrb[74].mxu1 }
 0x31d   : > { %v5036_v40 = vpop.f32.mrb[75].mxu1 }
 0x31e   : > { %v4137_v4 = vadd.f32 %v5034_v52, %v4073_v58 }
 0x322   : > { %v5054_v6 = vpop.f32.mrb[76].mxu1 }
 0x323   : > { %v5055_v61 = vpop.f32.mrb[77].mxu1 }
 0x324   : > { %v5056_v8 = vadd.f32 %v5055_v61, %v5054_v6  ;;  %v5057_v38 = vpop.f32.mrb[78].mxu1 }
 0x325   : > { %v5058_v59 = vpop.f32.mrb[79].mxu1 }
 0x326   : > { %v4177_v1 = vadd.f32 %v5056_v8, %v4113_v0  ;;  %v5059_v31 = vadd.f32 %v5058_v59, %v5057_v38 }
 0x328   : > { %v4180_v30 = vadd.f32 %v5059_v31, %v4116_v5 }
 0x32a   : > { %v5060_v51 = vpop.f32.mrb[80].mxu1 }
 0x32b   : > { %v5061_v46 = vpop.f32.mrb[81].mxu1 }
 0x32c   : > { %v5062_v10 = vadd.f32 %v5061_v46, %v5060_v51  ;;  %v5063_v22 = vpop.f32.mrb[82].mxu1 }
 0x32d   : > { %v5064_v20 = vpop.f32.mrb[83].mxu1 }
 0x32e   : > { %v4185_v13 = vadd.f32 %v5062_v10, %v4121_v47  ;;  %v5065_v14 = vadd.f32 %v5064_v20, %v5063_v22 }
 0x330   : > { %v4188_v57 = vadd.f32 %v5065_v14, %v4124_v41 }
 0x332   : > { %v5066_v16 = vpop.f32.mrb[84].mxu1 }
 0x333   : > { %v5067_v18 = vpop.f32.mrb[85].mxu1 }
 0x334   : > { %v5068_v21 = vadd.f32 %v5067_v18, %v5066_v16  ;;  %v5069_v58 = vpop.f32.mrb[86].mxu1 }
 0x335   : > { %v5070_v2 = vpop.f32.mrb[87].mxu1 }
 0x336   : > { %v4193_v9 = vadd.f32 %v5068_v21, %v4129_v50  ;;  %v5071_v19 = vadd.f32 %v5070_v2, %v5069_v58 }
 0x338   : > { %v4196_v25 = vadd.f32 %v5071_v19, %v4132_v35 }
 0x33a   : > { %v5072_v23 = vpop.f32.mrb[88].mxu1 }
 0x33b   : > { %v5073_v0 = vpop.f32.mrb[89].mxu1 }
 0x33c   : > { %v5074_v32 = vadd.f32 %v5073_v0, %v5072_v23  ;;  %v5075_v5 = vpop.f32.mrb[90].mxu1 }
 0x33d   : > { %v5076_v37 = vpop.f32.mrb[91].mxu1 }
 0x33e   : > { %v4201_v42 = vadd.f32 %v5074_v32, %v4137_v4 }
 0x342   : > { %v5094_v11 = vpop.f32.mrb[92].mxu1 }
 0x343   : > { %v5095_v62 = vpop.f32.mrb[93].mxu1 }
 0x344   : > { %v5096_v44 = vadd.f32 %v5095_v62, %v5094_v11  ;;  %v5097_v47 = vpop.f32.mrb[94].mxu1 }
 0x345   : > { %v5098_v63 = vpop.f32.mrb[95].mxu1 }
 0x346   : > { %v5099_v41 = vadd.f32 %v5098_v63, %v5097_v47  ;;  %v4241_v28 = vadd.f32 %v5096_v44, %v4177_v1 }
 0x348   : > { %v4244_v12 = vadd.f32 %v5099_v41, %v4180_v30 }
 0x34a   : > { %v5100_v26 = vpop.f32.mrb[96].mxu1 }
 0x34b   : > { %v5101_v60 = vpop.f32.mrb[97].mxu1 }
 0x34c   : > { %v5102_v3 = vadd.f32 %v5101_v60, %v5100_v26  ;;  %v5103_v50 = vpop.f32.mrb[98].mxu1 }
 0x34d   : > { %v5104_v29 = vpop.f32.mrb[99].mxu1 }
 0x34e   : > { %v5105_v35 = vadd.f32 %v5104_v29, %v5103_v50  ;;  %v4249_v53 = vadd.f32 %v5102_v3, %v4185_v13 }
 0x350   : > { %v4252_v55 = vadd.f32 %v5105_v35, %v4188_v57 }
 0x352   : > { %v5106_v52 = vpop.f32.mrb[100].mxu1 }
 0x353   : > { %v5107_v27 = vpop.f32.mrb[101].mxu1 }
 0x354   : > { %v5108_v40 = vadd.f32 %v5107_v27, %v5106_v52  ;;  %v5109_v4 = vpop.f32.mrb[102].mxu1 }
 0x355   : > { %v5110_v6 = vpop.f32.mrb[103].mxu1 }
 0x356   : > { %v5111_v61 = vadd.f32 %v5110_v6, %v5109_v4  ;;  %v4257_v8 = vadd.f32 %v5108_v40, %v4193_v9 }
 0x358   : > { %v4260_v38 = vadd.f32 %v5111_v61, %v4196_v25 }
 0x35a   : > { %v5112_v59 = vpop.f32.mrb[104].mxu1 }
 0x35b   : > { %v5113_v1 = vpop.f32.mrb[105].mxu1 }
 0x35c   : > { %v5114_v31 = vadd.f32 %v5113_v1, %v5112_v59  ;;  %v5115_v30 = vpop.f32.mrb[106].mxu1 }
 0x35d   : > { %v5116_v51 = vpop.f32.mrb[107].mxu1 }
 0x35e   : > { %v4265_v46 = vadd.f32 %v5114_v31, %v4201_v42 }
 0x37e   : > { %v4304_v10 = vpop.f32.mrb[108].mxu1 }
 0x37f   : > { %v4305_v22 = vadd.f32 %v4304_v10, %v4241_v28  ;;  %v4306_v20 = vpop.f32.mrb[109].mxu1 }
 0x380   : > { %v4307_v13 = vpop.f32.mrb[110].mxu1 }
 0x381   : > { %4336 = vst [vmem:[%s7077_s26 + $0x10] sm:$0xff] %v4305_v22  ;;  %v4308_v14 = vadd.f32 %v4307_v13, %v4244_v12  ;;  %v4309_v57 = vpop.f32.mrb[111].mxu1 }
 0x383   : > { %4339 = vst [vmem:[%s7077_s26 + $0x28] sm:$0xff] %v4308_v14 }
 0x386   : > { %v4312_v16 = vpop.f32.mrb[112].mxu1 }
 0x387   : > { %v4313_v18 = vadd.f32 %v4312_v16, %v4249_v53  ;;  %v4314_v21 = vpop.f32.mrb[113].mxu1 }
 0x388   : > { %v4315_v58 = vpop.f32.mrb[114].mxu1 }
 0x389   : > { %4342 = vst [vmem:[%s7077_s26 + $0x40] sm:$0xff] %v4313_v18  ;;  %v4316_v2 = vadd.f32 %v4315_v58, %v4252_v55  ;;  %v4317_v9 = vpop.f32.mrb[115].mxu1 }
 0x38b   : > { %4345 = vst [vmem:[%s7077_s26 + $0x58] sm:$0xff] %v4316_v2 }
 0x38e   : > { %v4320_v19 = vpop.f32.mrb[116].mxu1 }
 0x38f   : > { %v4321_v25 = vadd.f32 %v4320_v19, %v4257_v8  ;;  %v4322_v23 = vpop.f32.mrb[117].mxu1 }
 0x390   : > { %v4323_v0 = vpop.f32.mrb[118].mxu1 }
 0x391   : > { %4348 = vst [vmem:[%s7077_s26 + $0x70] sm:$0xff] %v4321_v25  ;;  %v4324_v32 = vadd.f32 %v4323_v0, %v4260_v38  ;;  %v4325_v5 = vpop.f32.mrb[119].mxu1 }
 0x393   : > { %4351 = vst [vmem:[%s7077_s26 + $0x88] sm:$0xff] %v4324_v32 }
 0x396   : > { %v4328_v37 = vpop.f32.mrb[120].mxu1 }
 0x397   : > { %v4329_v42 = vadd.f32 %v4328_v37, %v4265_v46  ;;  %v4330_v11 = vpop.f32.mrb[121].mxu1 }
 0x398   : > { %v4331_v62 = vpop.f32.mrb[122].mxu1 }
 0x399   : > { %4354 = vst [vmem:[%s7077_s26 + $0xa0] sm:$0x1] %v4329_v42  ;;  %v4332_v44 = vpop.f32.mrb[123].mxu1 }
 0x39f   : > { %v3913_v47 = vpop.f32.mrb[12].mxu0 }
 0x3a0   : > { %v5118_v63 = vadd.f32 %v3913_v47, %v6991_v15  ;;  %v3915_v41 = vpop.f32.mrb[13].mxu0 }
 0x3a1   : > { %v5119_v28 = vadd.f32 %v3915_v41, %v6993_v36  ;;  %v3917_v12 = vpop.f32.mrb[14].mxu0 }
 0x3a2   : > { %4334 = vst [vmem:[%s7077_s26] sm:$0xff] %v5118_v63  ;;  %v5120_v26 = vadd.f32 %v3917_v12, %v6995_v17  ;;  %v3919_v60 = vpop.f32.mrb[15].mxu0 }
 0x3a3   : > { %4335 = vst [vmem:[%s7077_s26 + $0x8] sm:$0xff] %v5119_v28  ;;  %v5121_v3 = vadd.f32 %v3919_v60, %v7002_v49 }
 0x3a4   : > { %4337 = vst [vmem:[%s7077_s26 + $0x18] sm:$0xff] %v5120_v26 }
 0x3a5   : > { %4338 = vst [vmem:[%s7077_s26 + $0x20] sm:$0xff] %v5121_v3 }
 0x3a7   : > { %v3923_v50 = vpop.f32.mrb[16].mxu0 }
 0x3a8   : > { %v5122_v15 = vadd.f32 %v3923_v50, %v7016_v34  ;;  %v3925_v29 = vpop.f32.mrb[17].mxu0 }
 0x3a9   : > { %v5123_v36 = vadd.f32 %v3925_v29, %v7019_v39  ;;  %v3927_v35 = vpop.f32.mrb[18].mxu0 }
 0x3aa   : > { %4340 = vst [vmem:[%s7077_s26 + $0x30] sm:$0xff] %v5122_v15  ;;  %v5124_v17 = vadd.f32 %v3927_v35, %v7023_v43  ;;  %v3929_v53 = vpop.f32.mrb[19].mxu0 }
 0x3ab   : > { %4341 = vst [vmem:[%s7077_s26 + $0x38] sm:$0xff] %v5123_v36  ;;  %v5125_v49 = vadd.f32 %v3929_v53, %v7028_v48 }
 0x3ac   : > { %4343 = vst [vmem:[%s7077_s26 + $0x48] sm:$0xff] %v5124_v17 }
 0x3ad   : > { %4344 = vst [vmem:[%s7077_s26 + $0x50] sm:$0xff] %v5125_v49 }
 0x3af   : > { %v3933_v34 = vpop.f32.mrb[20].mxu0 }
 0x3b0   : > { %v5126_v55 = vadd.f32 %v3933_v34, %v7038_v45  ;;  %v3935_v52 = vpop.f32.mrb[21].mxu0 }
 0x3b1   : > { %v5127_v39 = vadd.f32 %v3935_v52, %v7042_v33  ;;  %v3937_v27 = vpop.f32.mrb[22].mxu0 }
 0x3b2   : > { %4346 = vst [vmem:[%s7077_s26 + $0x60] sm:$0xff] %v5126_v55  ;;  %v5128_v43 = vadd.f32 %v3937_v27, %v7046_v54  ;;  %v3939_v40 = vpop.f32.mrb[23].mxu0 }
 0x3b3   : > { %4347 = vst [vmem:[%s7077_s26 + $0x68] sm:$0xff] %v5127_v39  ;;  %v5129_v48 = vadd.f32 %v3939_v40, %v7049_v56 }
 0x3b4   : > { %4349 = vst [vmem:[%s7077_s26 + $0x78] sm:$0xff] %v5128_v43 }
 0x3b5   : > { %4350 = vst [vmem:[%s7077_s26 + $0x80] sm:$0xff] %v5129_v48 }
 0x3b7   : > { %v3943_v45 = vpop.f32.mrb[24].mxu0 }
 0x3b8   : > { %v5130_v4 = vadd.f32 %v3943_v45, %v7056_v7  ;;  %v3945_v33 = vpop.f32.mrb[25].mxu0 }
 0x3b9   : > { %v5131_v54 = vadd.f32 %v3945_v33, %v7059_v24  ;;  %v3947_v56 = vpop.f32.mrb[26].mxu0 }
 0x3ba   : > { %4352 = vst [vmem:[%s7077_s26 + $0x90] sm:$0x1] %v5130_v4  ;;  %v3948_v6 = vpop.f32.mrb[27].mxu0 }
 0x3bb   : > { %4353 = vst [vmem:[%s7077_s26 + $0x98] sm:$0x1] %v5131_v54 }
 0x3bc   : > { %6040 = shalt.err (!%p6037_p6)
}
 0x3bd   : > { %s6041_s24 = scalar_lea.hbm %s7116_s17, 2688  ;;  %s6045_s6 = scalar_lea.hbm %s7169_s5, 10752 }
 0x3be   : > { %p6042_p13 = scmp.ne.s32.totalorder %s7116_s17, %s6041_s24  ;;  %p6046_p9 = scmp.lt.u32.totalorder %s7116_s17, %s7169_s5 }
 0x3bf   : > { %p6047_p0 = scmp.lt.u32.totalorder %s6045_s6, %s6041_s24  ;;  %p6049_p1 = scmp.lt.u32.totalorder %s6041_s24, %s7116_s17 }
 0x3c0   : > { %p6043_p3 = pnand %p6042_p13, %p7202_p2 }
 0x3c1   : > { %p6048_p10 = por %p6047_p0, %p6046_p9 }
 0x3c2   : > { %p6044_p5 = pneg %p6043_p3 }
 0x3c3   : > { %p6050_p8 = por %p6049_p1, %p6048_p10 }
 0x3c5   : > { %p6051_p7 = pnand %p6050_p8, %p6044_p5 }
 0x3c7   : > { %6054 = shalt.err (!%p6051_p7)
}
 0x3c8   : > { %s6120_s0 = smov 384   ;;  %s6121_s25 = smov 1536  }
 0x3c9   : > { %s6122_s14 = smov 24  }
 0x3ca   : > { %5217 = dma.vmem_to_hbm [thread:$0]  (%p7202_p2), %s7118_s28, 2688, %s7116_s17, %s4356_s22, %s6120_s0, %s6121_s25, %s6122_s14  }
 0x3cb PF: > { %s7203_s29 = sld [smem:[#allocation19_spill]]  ;;  %p5249_p11 = scmp.ge.s32.totalorder %s6105_s21, 2 }
 0x3cc   : > { %s4384_s26 = sand.u32 1, %s6093_s18  }
 0x3cd   : > { %s4385_s10 = scalar_lea.sflag [#allocation4], %s4384_s26 }
 0x3d1   : > { %p7204_p12 = scmp.ne.s32.totalorder %s7203_s29, 0 }
 0x3d3   : > { %p5237_p4 = pnand %p5249_p11, %p7204_p12 }
 0x3d5   : > { %6088 = dma.done.wait (!%p5237_p4), %s4385_s10, 2688  }
 0x3d6   : > { %6090 = vsyncadd (!%p5237_p4), %s4385_s10, 4294964608  ;;  %s7205_s21 = sld [smem:[#allocation17_spill]]  ;;  %s7206_s8 = sld [smem:[#allocation18_spill]] }
 0x3d7   : > { %s7207_s18 = smov %s6097_s19  ;;  %s7208_s19 = smov %s6101_s20 }
 0x3dc   : > { %p18_p6 = scmp.ge.s32.totalorder %s7205_s21, 6   ;;  %s7209_s20 = smov %s7206_s8 }
 0x3de   :  { %20 = sbr.rel (!%p18_p6) target bundleno = 9 (0x9), region = 100 }
 0x3e5   :  { %4390 = vsyncpa [#allocation3], 1 }
 0x3e6   :  { %4392 = vsyncpa [#allocation3 + $0x1], 1 }
 0x3e7   :  { %4393 = vsyncpa [#allocation6], 1 }
 0x3e8   :  { %4394 = vsyncpa [#allocation9], 1 }
 0x3e9   :  { %4395 = vsyncpa [#allocation4], 1 }
 0x3ea   :  { %4397 = vsyncpa [#allocation4 + $0x1], 1 }

</bundles_post_ra>
